<compile_context>
chip_gen: v6e
topology: v6e:2x2x1
jax: 0.10.0
libtpu: 0.0.40
codegen_flags: <defaults>
</compile_context>

<pallas_src>
import jax
import jax.numpy as jnp
from jax.experimental import pallas as pl
from jax.experimental.pallas import tpu as pltpu

# ----- module hyper-parameters (from TransformerBlock.__init__) -----
N_HEADS = 16
DIM = 128
HEAD_DIM = DIM // N_HEADS            # 8
_ff_hidden = int(2 * (4 * DIM) / 3)  # 341
MULTIPLE_OF = 8
HIDDEN_DIM = MULTIPLE_OF * ((_ff_hidden + MULTIPLE_OF - 1) // MULTIPLE_OF)  # 344 (logical)
HIDDEN_PAD = 384                     # padded to a multiple of 128 for lane-dense tiles


def transformer_block_kernel(x_ref, wqkv_ref, wo_ref, w13_ref, w2_ref, g_ref, out_ref):
    B, S, D = x_ref.shape
    M = B * S
    HP = HIDDEN_PAD

    x = x_ref[...]                                  # (B, S, D) f32
    xt = x.reshape(M, D)                            # (tokens, D) f32
    xt_bf = xt.astype(jnp.bfloat16)

    # ---- fused QKV projection: one MXU pass with N = 3*D = 384 ----
    qkv = jnp.dot(xt_bf, wqkv_ref[...], preferred_element_type=jnp.float32)  # (M, 3D) f32
    q = qkv[:, :D].reshape(B, S, D)
    k = qkv[:, D:2 * D].reshape(B, S, D)
    v = qkv[:, 2 * D:].reshape(B, S, D)

    # ---- attention core (no head split/merge transposes) ----
    # G[m, l] = 1 iff lanes m, l belong to the same head (precomputed on host). Then:
    #   scores[b, i, j, l] = sum_{m in head(l)} q[b, i, m] * k[b, j, m]
    # i.e. the per-head score broadcast across that head's lane group — one full-depth
    # (K = 128) MXU matmul instead of 16 tiny K=8 matmuls + relayouts.
    prod = q[:, :, None, :] * k[:, None, :, :]      # (B, S, S, D) f32
    scores = jnp.dot(prod.reshape(M * S, D).astype(jnp.bfloat16), g_ref[...],
                     preferred_element_type=jnp.float32).reshape(B, S, S, D)

    # softmax over the key axis (axis=2); math in f32.  (Reference applies no
    # 1/sqrt(head_dim) scaling, matching the PyTorch module.)
    m_ = jnp.max(scores, axis=2, keepdims=True)     # (B, S, 1, D)
    p = jnp.exp(scores - m_)
    p = p * pl.reciprocal(jnp.sum(p, axis=2, keepdims=True), approx=True)

    # attn[b,i,l] = sum_j p[b,i,j,l] * v[b,j,l]   (sublane reduce, no head transpose)
    attn = jnp.sum(p * v[:, None, :, :], axis=2)    # (B, S, D) f32
    attn = attn.reshape(M, D)

    attn_out = jnp.dot(attn.astype(jnp.bfloat16), wo_ref[...],
                       preferred_element_type=jnp.float32)      # (M, D)
    h = xt + attn_out                               # residual 1 (f32)

    # ---- SwiGLU FFN: fused, padded w1|w3 then w2 ----
    h13 = jnp.dot(h.astype(jnp.bfloat16), w13_ref[...],
                  preferred_element_type=jnp.float32)           # (M, 2*HP)
    h1 = h13[:, :HP]
    h3 = h13[:, HP:]
    gated = (h1 * jax.nn.sigmoid(h1)) * h3                      # silu(h1)*h3, f32 (EUP)
    ffn = jnp.dot(gated.astype(jnp.bfloat16), w2_ref[...],
                  preferred_element_type=jnp.float32)           # (M, D)

    out_ref[...] = (h + ffn).reshape(B, S, D).astype(out_ref.dtype)   # residual 2


def prepare_weights(wq, wk, wv, wo, w1, w3, w2):
    """Fuse / pad / cast the per-layer weights once (outside the kernel call path).

    All weights are (in, out), i.e. transposed nn.Linear weights.
    """
    HP = HIDDEN_PAD
    wqkv = jnp.concatenate([wq, wk, wv], axis=1).astype(jnp.bfloat16)          # (D, 3D)
    pad_cols = lambda w: jnp.pad(w, ((0, 0), (0, HP - w.shape[1])))
    w13 = jnp.concatenate([pad_cols(w1), pad_cols(w3)], axis=1).astype(jnp.bfloat16)  # (D, 2*HP)
    w2p = jnp.pad(w2, ((0, HP - w2.shape[0]), (0, 0))).astype(jnp.bfloat16)    # (HP, D)
    wo_b = wo.astype(jnp.bfloat16)                                             # (D, D)
    # block-diagonal head-grouping matrix for the in-kernel score matmul
    li = jax.lax.broadcasted_iota(jnp.int32, (DIM, DIM), 0) // HEAD_DIM
    lj = jax.lax.broadcasted_iota(jnp.int32, (DIM, DIM), 1) // HEAD_DIM
    g = jnp.where(li == lj, 1.0, 0.0).astype(jnp.bfloat16)                     # (D, D)
    return wqkv, wo_b, w13, w2p, g


@jax.jit
def transformer_block_fused(x, wqkv, wo_b, w13, w2p, g):
    """x: (B, S, D) f32; remaining args from prepare_weights()."""
    B, S, D = x.shape
    HP = HIDDEN_PAD
    full2d = lambda shape: pl.BlockSpec(shape, lambda i: (0, 0))
    return pl.pallas_call(
        transformer_block_kernel,
        out_shape=jax.ShapeDtypeStruct((B, S, D), x.dtype),
        grid_spec=pltpu.PrefetchScalarGridSpec(
            num_scalar_prefetch=0,
            grid=(1,),                 # 16 tokens total: single invocation, no per-step overhead
            in_specs=[
                pl.BlockSpec((B, S, D), lambda i: (0, 0, 0)),
                full2d((D, 3 * D)),
                full2d((D, D)),
                full2d((D, 2 * HP)),
                full2d((HP, D)),
                full2d((D, D)),
            ],
            out_specs=pl.BlockSpec((B, S, D), lambda i: (0, 0, 0)),
        ),
        compiler_params=pltpu.CompilerParams(
            dimension_semantics=("arbitrary",)),
    )(x, wqkv, wo_b, w13, w2p, g)


def transformer_block(x, wq, wk, wv, wo, w1, w3, w2):
    """Convenience wrapper matching the original (unfused) signature."""
    return transformer_block_fused(x, *prepare_weights(wq, wk, wv, wo, w1, w3, w2))


def reference_block(x, wq, wk, wv, wo, w1, w3, w2):
    """Pure-JAX f32 reference matching the PyTorch module (use_sp=False)."""
    B, S, D = x.shape
    xq = (x @ wq).reshape(B, S, N_HEADS, HEAD_DIM).transpose(0, 2, 1, 3)
    xk = (x @ wk).reshape(B, S, N_HEADS, HEAD_DIM).transpose(0, 2, 1, 3)
    xv = (x @ wv).reshape(B, S, N_HEADS, HEAD_DIM).transpose(0, 2, 1, 3)
    scores = jnp.einsum('bhqd,bhkd->bhqk', xq, xk)
    p = jax.nn.softmax(scores.astype(jnp.float32), axis=-1).astype(xq.dtype)
    o = jnp.einsum('bhqk,bhkd->bhqd', p, xv).transpose(0, 2, 1, 3).reshape(B, S, D)
    h = x + o @ wo
    ffn = (jax.nn.silu(h @ w1) * (h @ w3)) @ w2
    return h + ffn


if __name__ == "__main__":
    B, S = 2, 8
    key = jax.random.PRNGKey(0)
    ks = jax.random.split(key, 8)

    x = jax.random.normal(ks[0], (B, S, DIM), dtype=jnp.float32)
    scale = 0.02
    # weights stored as (in, out), i.e. already-transposed nn.Linear weights
    wq = scale * jax.random.normal(ks[1], (DIM, DIM), dtype=jnp.float32)
    wk = scale * jax.random.normal(ks[2], (DIM, DIM), dtype=jnp.float32)
    wv = scale * jax.random.normal(ks[3], (DIM, DIM), dtype=jnp.float32)
    wo = scale * jax.random.normal(ks[4], (DIM, DIM), dtype=jnp.float32)
    w1 = scale * jax.random.normal(ks[5], (DIM, HIDDEN_DIM), dtype=jnp.float32)
    w3 = scale * jax.random.normal(ks[6], (DIM, HIDDEN_DIM), dtype=jnp.float32)
    w2 = scale * jax.random.normal(ks[7], (HIDDEN_DIM, DIM), dtype=jnp.float32)

    fused = prepare_weights(wq, wk, wv, wo, w1, w3, w2)
    fused = jax.block_until_ready(fused)

    out = transformer_block_fused(x, *fused)
    out = jax.block_until_ready(out)

    ref = reference_block(x, wq, wk, wv, wo, w1, w3, w2)
    assert out.shape == (B, S, DIM)
    # tolerance loosened for bf16 MXU operands + approx reciprocal (f32 accumulation kept)
    assert jnp.allclose(out, ref, atol=2e-2, rtol=2e-2), "mismatch vs JAX reference"

    print("KERNEL_OK")
</pallas_src>

<mosaic_0001>
module attributes {stable_mosaic.version = 11 : i64} {
  func.func @transformer_block_kernel(%arg0: i32, %arg1: memref<2x8x128xf32, #tpu.memory_space<vmem>>, %arg2: memref<128x384xbf16, #tpu.memory_space<vmem>>, %arg3: memref<128x128xbf16, #tpu.memory_space<vmem>>, %arg4: memref<128x768xbf16, #tpu.memory_space<vmem>>, %arg5: memref<384x128xbf16, #tpu.memory_space<vmem>>, %arg6: memref<128x128xbf16, #tpu.memory_space<vmem>>, %arg7: memref<2x8x128xf32, #tpu.memory_space<vmem>>) attributes {dimension_semantics = [#tpu.dimension_semantics<arbitrary>], iteration_bounds = array<i64: 1>, scalar_prefetch = 0 : i64, scratch_operands = 0 : i64, tpu.core_type = #tpu.core_type<tc>, window_params = [{pipeline_mode = #tpu.pipeline_mode<synchronous>, transform_indices = @transform_0, window_bounds = array<i64: 2, 8, 128>}, {pipeline_mode = #tpu.pipeline_mode<synchronous>, transform_indices = @transform_1, window_bounds = array<i64: 128, 384>}, {pipeline_mode = #tpu.pipeline_mode<synchronous>, transform_indices = @transform_2, window_bounds = array<i64: 128, 128>}, {pipeline_mode = #tpu.pipeline_mode<synchronous>, transform_indices = @transform_3, window_bounds = array<i64: 128, 768>}, {pipeline_mode = #tpu.pipeline_mode<synchronous>, transform_indices = @transform_4, window_bounds = array<i64: 384, 128>}, {pipeline_mode = #tpu.pipeline_mode<synchronous>, transform_indices = @transform_5, window_bounds = array<i64: 128, 128>}, {pipeline_mode = #tpu.pipeline_mode<synchronous>, transform_indices = @transform_6, window_bounds = array<i64: 2, 8, 128>}]} {
    %c0 = arith.constant 0 : index
    %c0_0 = arith.constant 0 : index
    %c0_1 = arith.constant 0 : index
    %0 = vector.load %arg1[%c0, %c0_0, %c0_1] : memref<2x8x128xf32, #tpu.memory_space<vmem>>, vector<2x8x128xf32>
    %1 = vector.shape_cast %0 : vector<2x8x128xf32> to vector<16x128xf32>
    %2 = arith.truncf %1 : vector<16x128xf32> to vector<16x128xbf16>
    %c0_2 = arith.constant 0 : index
    %c0_3 = arith.constant 0 : index
    %3 = vector.load %arg2[%c0_2, %c0_3] : memref<128x384xbf16, #tpu.memory_space<vmem>>, vector<128x384xbf16>
    %cst = arith.constant dense<0.000000e+00> : vector<16x384xf32>
    %4 = tpu.matmul %2, %3, %cst {dimension_numbers = #tpu.dot_dimension_numbers<[1], [0], [0], [1], [0, 0, 1, 1], [], []>} : vector<16x128xbf16>, vector<128x384xbf16>, vector<16x384xf32> -> vector<16x384xf32>
    %5 = vector.extract_strided_slice %4 {offsets = [0, 0], sizes = [16, 128], strides = [1, 1]} : vector<16x384xf32> to vector<16x128xf32>
    %6 = vector.shape_cast %5 : vector<16x128xf32> to vector<2x8x128xf32>
    %7 = vector.extract_strided_slice %4 {offsets = [0, 128], sizes = [16, 128], strides = [1, 1]} : vector<16x384xf32> to vector<16x128xf32>
    %8 = vector.shape_cast %7 : vector<16x128xf32> to vector<2x8x128xf32>
    %9 = vector.extract_strided_slice %4 {offsets = [0, 256], sizes = [16, 128], strides = [1, 1]} : vector<16x384xf32> to vector<16x128xf32>
    %10 = vector.shape_cast %9 : vector<16x128xf32> to vector<2x8x128xf32>
    %11 = vector.shape_cast %6 : vector<2x8x128xf32> to vector<2x8x1x128xf32>
    %12 = vector.shape_cast %8 : vector<2x8x128xf32> to vector<2x1x8x128xf32>
    %13 = vector.broadcast %11 : vector<2x8x1x128xf32> to vector<2x8x8x128xf32>
    %14 = vector.broadcast %12 : vector<2x1x8x128xf32> to vector<2x8x8x128xf32>
    %15 = arith.mulf %13, %14 : vector<2x8x8x128xf32>
    %16 = vector.shape_cast %15 : vector<2x8x8x128xf32> to vector<128x128xf32>
    %17 = arith.truncf %16 : vector<128x128xf32> to vector<128x128xbf16>
    %c0_4 = arith.constant 0 : index
    %c0_5 = arith.constant 0 : index
    %18 = vector.load %arg6[%c0_4, %c0_5] : memref<128x128xbf16, #tpu.memory_space<vmem>>, vector<128x128xbf16>
    %cst_6 = arith.constant dense<0.000000e+00> : vector<128x128xf32>
    %19 = tpu.matmul %17, %18, %cst_6 {dimension_numbers = #tpu.dot_dimension_numbers<[1], [0], [0], [1], [0, 0, 1, 1], [], []>} : vector<128x128xbf16>, vector<128x128xbf16>, vector<128x128xf32> -> vector<128x128xf32>
    %20 = vector.shape_cast %19 : vector<128x128xf32> to vector<2x8x8x128xf32>
    %cst_7 = arith.constant dense<0xFF800000> : vector<2x8x128xf32>
    %21 = vector.multi_reduction <maximumf>, %20, %cst_7 [2] : vector<2x8x8x128xf32> to vector<2x8x128xf32>
    %22 = vector.shape_cast %21 : vector<2x8x128xf32> to vector<2x8x1x128xf32>
    %23 = vector.broadcast %22 : vector<2x8x1x128xf32> to vector<2x8x8x128xf32>
    %24 = arith.subf %20, %23 : vector<2x8x8x128xf32>
    %25 = math.exp %24 : vector<2x8x8x128xf32>
    %cst_8 = arith.constant dense<0.000000e+00> : vector<2x8x128xf32>
    %26 = vector.multi_reduction <add>, %25, %cst_8 [2] : vector<2x8x8x128xf32> to vector<2x8x128xf32>
    %27 = vector.shape_cast %26 : vector<2x8x128xf32> to vector<2x8x1x128xf32>
    %28 = tpu.reciprocal %27 {approx = true} : vector<2x8x1x128xf32> -> vector<2x8x1x128xf32>
    %29 = vector.broadcast %28 : vector<2x8x1x128xf32> to vector<2x8x8x128xf32>
    %30 = arith.mulf %25, %29 : vector<2x8x8x128xf32>
    %31 = vector.shape_cast %10 : vector<2x8x128xf32> to vector<2x1x8x128xf32>
    %32 = vector.broadcast %31 : vector<2x1x8x128xf32> to vector<2x8x8x128xf32>
    %33 = arith.mulf %30, %32 : vector<2x8x8x128xf32>
    %cst_9 = arith.constant dense<0.000000e+00> : vector<2x8x128xf32>
    %34 = vector.multi_reduction <add>, %33, %cst_9 [2] : vector<2x8x8x128xf32> to vector<2x8x128xf32>
    %35 = vector.shape_cast %34 : vector<2x8x128xf32> to vector<16x128xf32>
    %36 = arith.truncf %35 : vector<16x128xf32> to vector<16x128xbf16>
    %c0_10 = arith.constant 0 : index
    %c0_11 = arith.constant 0 : index
    %37 = vector.load %arg3[%c0_10, %c0_11] : memref<128x128xbf16, #tpu.memory_space<vmem>>, vector<128x128xbf16>
    %cst_12 = arith.constant dense<0.000000e+00> : vector<16x128xf32>
    %38 = tpu.matmul %36, %37, %cst_12 {dimension_numbers = #tpu.dot_dimension_numbers<[1], [0], [0], [1], [0, 0, 1, 1], [], []>} : vector<16x128xbf16>, vector<128x128xbf16>, vector<16x128xf32> -> vector<16x128xf32>
    %39 = arith.addf %1, %38 : vector<16x128xf32>
    %40 = arith.truncf %39 : vector<16x128xf32> to vector<16x128xbf16>
    %c0_13 = arith.constant 0 : index
    %c0_14 = arith.constant 0 : index
    %41 = vector.load %arg4[%c0_13, %c0_14] : memref<128x768xbf16, #tpu.memory_space<vmem>>, vector<128x768xbf16>
    %cst_15 = arith.constant dense<0.000000e+00> : vector<16x768xf32>
    %42 = tpu.matmul %40, %41, %cst_15 {dimension_numbers = #tpu.dot_dimension_numbers<[1], [0], [0], [1], [0, 0, 1, 1], [], []>} : vector<16x128xbf16>, vector<128x768xbf16>, vector<16x768xf32> -> vector<16x768xf32>
    %43 = vector.extract_strided_slice %42 {offsets = [0, 0], sizes = [16, 384], strides = [1, 1]} : vector<16x768xf32> to vector<16x384xf32>
    %44 = vector.extract_strided_slice %42 {offsets = [0, 384], sizes = [16, 384], strides = [1, 1]} : vector<16x768xf32> to vector<16x384xf32>
    %45 = arith.negf %43 : vector<16x384xf32>
    %46 = math.exp %45 : vector<16x384xf32>
    %cst_16 = arith.constant 1.000000e+00 : f32
    %47 = vector.broadcast %cst_16 : f32 to vector<16x384xf32>
    %48 = arith.addf %47, %46 : vector<16x384xf32>
    %49 = arith.divf %47, %48 : vector<16x384xf32>
    %50 = arith.mulf %43, %49 : vector<16x384xf32>
    %51 = arith.mulf %50, %44 : vector<16x384xf32>
    %52 = arith.truncf %51 : vector<16x384xf32> to vector<16x384xbf16>
    %c0_17 = arith.constant 0 : index
    %c0_18 = arith.constant 0 : index
    %53 = vector.load %arg5[%c0_17, %c0_18] : memref<384x128xbf16, #tpu.memory_space<vmem>>, vector<384x128xbf16>
    %cst_19 = arith.constant dense<0.000000e+00> : vector<16x128xf32>
    %54 = tpu.matmul %52, %53, %cst_19 {dimension_numbers = #tpu.dot_dimension_numbers<[1], [0], [0], [1], [0, 0, 1, 1], [], []>} : vector<16x384xbf16>, vector<384x128xbf16>, vector<16x128xf32> -> vector<16x128xf32>
    %55 = arith.addf %39, %54 : vector<16x128xf32>
    %56 = vector.shape_cast %55 : vector<16x128xf32> to vector<2x8x128xf32>
    %c0_20 = arith.constant 0 : index
    %c0_21 = arith.constant 0 : index
    %c0_22 = arith.constant 0 : index
    %57 = vector.load %arg7[%c0_20, %c0_21, %c0_22] : memref<2x8x128xf32, #tpu.memory_space<vmem>>, vector<2x8x128xf32>
    tpu.vector_store %arg7[%c0_20, %c0_21, %c0_22], %56 {strides = array<i32>} : memref<2x8x128xf32, #tpu.memory_space<vmem>>, vector<2x8x128xf32>,
    return
  }
  func.func @transform_0(%arg0: i32) -> (i32, i32, i32) {
    %c0_i32 = arith.constant 0 : i32
    %c0_i32_0 = arith.constant 0 : i32
    %c0_i32_1 = arith.constant 0 : i32
    %c0_i32_2 = arith.constant 0 : i32
    return %c0_i32, %c0_i32_0, %c0_i32_1 : i32, i32, i32
  }
  func.func @transform_1(%arg0: i32) -> (i32, i32) {
    %c0_i32 = arith.constant 0 : i32
    %c0_i32_0 = arith.constant 0 : i32
    %c0_i32_1 = arith.constant 0 : i32
    return %c0_i32, %c0_i32_0 : i32, i32
  }
  func.func @transform_2(%arg0: i32) -> (i32, i32) {
    %c0_i32 = arith.constant 0 : i32
    %c0_i32_0 = arith.constant 0 : i32
    %c0_i32_1 = arith.constant 0 : i32
    return %c0_i32, %c0_i32_0 : i32, i32
  }
  func.func @transform_3(%arg0: i32) -> (i32, i32) {
    %c0_i32 = arith.constant 0 : i32
    %c0_i32_0 = arith.constant 0 : i32
    %c0_i32_1 = arith.constant 0 : i32
    return %c0_i32, %c0_i32_0 : i32, i32
  }
  func.func @transform_4(%arg0: i32) -> (i32, i32) {
    %c0_i32 = arith.constant 0 : i32
    %c0_i32_0 = arith.constant 0 : i32
    %c0_i32_1 = arith.constant 0 : i32
    return %c0_i32, %c0_i32_0 : i32, i32
  }
  func.func @transform_5(%arg0: i32) -> (i32, i32) {
    %c0_i32 = arith.constant 0 : i32
    %c0_i32_0 = arith.constant 0 : i32
    %c0_i32_1 = arith.constant 0 : i32
    return %c0_i32, %c0_i32_0 : i32, i32
  }
  func.func @transform_6(%arg0: i32) -> (i32, i32, i32) {
    %c0_i32 = arith.constant 0 : i32
    %c0_i32_0 = arith.constant 0 : i32
    %c0_i32_1 = arith.constant 0 : i32
    %c0_i32_2 = arith.constant 0 : i32
    return %c0_i32, %c0_i32_0, %c0_i32_1 : i32, i32, i32
  }
}

</mosaic_0001>

<bundles_post_ra>
// kernel: transformer_block_fused.1
= control target key start
LH: loop header
LB: loop body
LE: loop exit
PB: predicated region body
PF: predicated region fallthrough
CT: control target
= control target key end

     0   :  { %11 = vsyncpa [#allocation3], 0  ;;  %s3067_s0 = inlined_call_operand.hbm [shape: f32[2,8,128], index: 0, kind: input, shape index: {}]   ;;  %s3068_s1 = inlined_call_operand.hbm [shape: bf16[128,384], index: 1, kind: input, shape index: {}]   ;;  %s3069_s2 = inlined_call_operand.hbm [shape: bf16[128,128], index: 2, kind: input, shape index: {}]   ;;  %s3070_s3 = inlined_call_operand.hbm [shape: bf16[128,768], index: 3, kind: input, shape index: {}]   ;;  %s3071_s4 = inlined_call_operand.hbm [shape: bf16[384,128], index: 4, kind: input, shape index: {}]   ;;  %s3072_s5 = inlined_call_operand.hbm [shape: bf16[128,128], index: 5, kind: input, shape index: {}]   ;;  %s3073_s6 = inlined_call_operand.hbm [shape: f32[2,8,128], index: 6, kind: output, shape index: {}]  }
   0x1   :  { %12 = vsyncpa [#allocation6], 0 }
   0x2   :  { %13 = vsyncpa [#allocation9], 0 }
   0x3   :  { %14 = vsyncpa [#allocation12], 0 }
   0x4   :  { %15 = vsyncpa [#allocation4], 0  ;;  %s2726_s21 = smov [#allocation5]  }
   0x5   :  { %s33_s22 = sshll.u32 %s2726_s21, 4  ;;  %s34_s22 = int_to_ptr.vmem [resolvable:$true] %s33_s22 }
   0x6   :  { %s2584_s23 = scalar_lea.vmem %s34_s22, 3072  ;;  %p2589_p1 = scmp.lt.s32.totalorder %s34_s22, %s34_s22 }
   0x7   :  { %p2585_p0 = scmp.ne.s32.totalorder %s34_s22, %s2584_s23  ;;  %p2590_p2 = scmp.lt.s32.totalorder %s2584_s23, %s2584_s23 }
   0x9   :  { %p2591_p3 = por %p2590_p2, %p2589_p1 }
   0xb   :  { %p2592_p4 = pnand %p2591_p3, %p2585_p0 }
   0xd   :  { %2595 = shalt.err (!%p2592_p4)
}
   0xe   :  { %s2727_s24 = smov 192   ;;  %s2728_s25 = smov 12  }
   0xf   :  { %39 = dma.hbm_to_vmem [thread:$0]  %s3068_s1, 3072, %s34_s22, [#allocation6], %s2727_s24, %s2727_s24, %s2728_s25  }
  0x10   :  { %s2729_s28 = smov [#allocation8]  }
  0x11   :  { %s57_s29 = sshll.u32 %s2729_s28, 4  ;;  %s58_s29 = int_to_ptr.vmem [resolvable:$true] %s57_s29 }
  0x12   :  { %s2604_s30 = scalar_lea.vmem %s58_s29, 6144  ;;  %p2609_p6 = scmp.lt.s32.totalorder %s58_s29, %s58_s29 }
  0x13   :  { %p2605_p5 = scmp.ne.s32.totalorder %s58_s29, %s2604_s30  ;;  %p2610_p7 = scmp.lt.s32.totalorder %s2604_s30, %s2604_s30 }
  0x15   :  { %p2611_p8 = por %p2610_p7, %p2609_p6 }
  0x17   :  { %p2612_p9 = pnand %p2611_p8, %p2605_p5 }
  0x19   :  { %2615 = shalt.err (!%p2612_p9)
}
  0x1a   :  { %s2730_s7 = smov 384   ;;  %s2731_s8 = smov 24  }
  0x1b   :  { %63 = dma.hbm_to_vmem [thread:$0]  %s3070_s3, 6144, %s58_s29, [#allocation9], %s2730_s7, %s2730_s7, %s2731_s8  }
  0x1c   :  { %s2732_s11 = smov [#allocation2]  }
  0x1d   :  { %s21_s12 = sshll.u32 %s2732_s11, 4  ;;  %s22_s12 = int_to_ptr.vmem [resolvable:$true] %s21_s12 }
  0x1e   :  { %s2624_s1 = scalar_lea.vmem %s22_s12, 256  ;;  %p2629_p11 = scmp.lt.s32.totalorder %s22_s12, %s22_s12 }
  0x1f   :  { %p2625_p10 = scmp.ne.s32.totalorder %s22_s12, %s2624_s1  ;;  %p2630_p12 = scmp.lt.s32.totalorder %s2624_s1, %s2624_s1 }
  0x21   :  { %p2631_p13 = por %p2630_p12, %p2629_p11 }
  0x23   :  { %p2632_p0 = pnand %p2631_p13, %p2625_p10 }
  0x25   :  { %2635 = shalt.err (!%p2632_p0)
}
  0x26   :  { %s2733_s13 = smov 128   ;;  %s2734_s14 = smov 8  }
  0x27   :  { %27 = dma.hbm_to_vmem [thread:$0]  %s3067_s0, 256, %s22_s12, [#allocation3], %s2733_s13, %s2733_s13, %s2734_s14  }
  0x28   :  { %s2735_s3 = smov [#allocation7]  }
  0x29   :  { %s45_s17 = sshll.u32 %s2735_s3, 4  ;;  %s46_s17 = int_to_ptr.vmem [resolvable:$true] %s45_s17 }
  0x2a   :  { %s2644_s18 = scalar_lea.vmem %s46_s17, 1024  ;;  %p2649_p2 = scmp.lt.s32.totalorder %s46_s17, %s46_s17 }
  0x2b   :  { %p2645_p1 = scmp.ne.s32.totalorder %s46_s17, %s2644_s18  ;;  %p2650_p3 = scmp.lt.s32.totalorder %s2644_s18, %s2644_s18 }
  0x2d   :  { %p2651_p4 = por %p2650_p3, %p2649_p2 }
  0x2f   :  { %p2652_p5 = pnand %p2651_p4, %p2645_p1 }
  0x31   :  { %2655 = shalt.err (!%p2652_p5)
}
  0x32   :  { %s2736_s19 = smov 64   ;;  %s2737_s20 = smov 4  }
  0x33   :  { %51 = dma.hbm_to_vmem [thread:$0]  %s3069_s2, 1024, %s46_s17, [#allocation6], %s2736_s19, %s2736_s19, %s2737_s20  }
  0x34   :  { %s2738_s23 = smov [#allocation10]   ;;  %s2739_s25 = smov [#allocation11]  }
  0x35   :  { %s69_s24 = sshll.u32 %s2738_s23, 4  ;;  %s81_s0 = sshll.u32 %s2739_s25, 4  ;;  %s70_s24 = int_to_ptr.vmem [resolvable:$true] %s69_s24  ;;  %s82_s0 = int_to_ptr.vmem [resolvable:$true] %s81_s0 }
  0x36   :  { %s2664_s26 = scalar_lea.vmem %s70_s24, 3072  ;;  %p2669_p7 = scmp.lt.s32.totalorder %s70_s24, %s70_s24 }
  0x37   :  { %p2665_p6 = scmp.ne.s32.totalorder %s70_s24, %s2664_s26  ;;  %p2670_p8 = scmp.lt.s32.totalorder %s2664_s26, %s2664_s26 }
  0x39   :  { %p2671_p9 = por %p2670_p8, %p2669_p7 }
  0x3b   :  { %p2672_p10 = pnand %p2671_p9, %p2665_p6 }
  0x3d   :  { %2675 = shalt.err (!%p2672_p10)
}
  0x3e   :  { %75 = dma.hbm_to_vmem [thread:$0]  %s3071_s4, 3072, %s70_s24, [#allocation9], %s2736_s19, %s2736_s19, %s2737_s20  }
  0x3f   :  { %s2684_s29 = scalar_lea.vmem %s82_s0, 1024  ;;  %p2689_p12 = scmp.lt.s32.totalorder %s82_s0, %s82_s0 }
  0x40   :  { %p2685_p11 = scmp.ne.s32.totalorder %s82_s0, %s2684_s29  ;;  %p2690_p13 = scmp.lt.s32.totalorder %s2684_s29, %s2684_s29 }
  0x42   :  { %p2691_p0 = por %p2690_p13, %p2689_p12 }
  0x44   :  { %p2692_p1 = pnand %p2691_p0, %p2685_p11 }
  0x46   :  { %2695 = shalt.err (!%p2692_p1)
}
  0x47   :  { %87 = dma.hbm_to_vmem [thread:$0]  %s3072_s5, 1024, %s82_s0, [#allocation12], %s2736_s19, %s2736_s19, %s2737_s20  }
  0x48   :  { %2716 = dma.done.wait [#allocation3], 256  }
  0x49   :  { %2717 = vsyncadd [#allocation3], 4294967040 }
  0x4a   :  { %2718 = dma.done.wait [#allocation6], 4096  }
  0x4b   :  { %2719 = vsyncadd [#allocation6], 4294963200 }
  0x4c   :  { %2720 = dma.done.wait [#allocation9], 9216  }
  0x4d   :  { %2721 = vsyncadd [#allocation9], 4294958080 }
  0x4e   :  { %2722 = dma.done.wait [#allocation12], 1024  }
  0x4f   :  { %2723 = vsyncadd [#allocation12], 4294966272  ;;  %v2740_v0 = vmov 0   ;;  %v2342_v1 = vld [vmem:[#allocation5 + $0xac] ss:$12 sps:$4 sm:$0xff]   ;;  %v107_v17 = vld [vmem:[#allocation2] sm:$0xff]  ;;  %v360_v39 = vlaneseq }
  0x50   :  { %302 = vmatprep.mubr.bf16.mxu0 %v2740_v0  ;;  %v2344_v2 = vld [vmem:[#allocation5 + $0xa8] ss:$12 sps:$4 sm:$0xff]   ;;  %270 = vmatprep.subr.bf16.mxu0 %v2342_v1  ;;  %v2347_v4 = vld [vmem:[#allocation5 + $0x90] ss:$12 sps:$4 sm:$0xff]   ;;  %v2350_v6 = vld [vmem:[#allocation5 + $0x78] ss:$12 sps:$4 sm:$0xff]  }
  0x51   :  { %v2345_v3 = vld [vmem:[#allocation5 + $0x94] ss:$12 sps:$4 sm:$0xff]   ;;  %271 = vmatpush1.bf16.msra.mxu0 %v2344_v2  ;;  %v2348_v5 = vld [vmem:[#allocation5 + $0x7c] ss:$12 sps:$4 sm:$0xff]   ;;  %v2351_v7 = vld [vmem:[#allocation5 + $0x64] ss:$12 sps:$4 sm:$0xff]  }
  0x52   :  { %272 = vmatprep.subr.bf16.mxu0 %v2345_v3  ;;  %v2353_v8 = vld [vmem:[#allocation5 + $0x60] ss:$12 sps:$4 sm:$0xff]   ;;  %v2356_v10 = vld [vmem:[#allocation5 + $0x48] ss:$12 sps:$4 sm:$0xff]   ;;  %v2359_v12 = vld [vmem:[#allocation5 + $0x30] ss:$12 sps:$4 sm:$0xff]  }
  0x53   :  { %v2354_v9 = vld [vmem:[#allocation5 + $0x4c] ss:$12 sps:$4 sm:$0xff]   ;;  %v2357_v11 = vld [vmem:[#allocation5 + $0x34] ss:$12 sps:$4 sm:$0xff]   ;;  %v2360_v13 = vld [vmem:[#allocation5 + $0x1c] ss:$12 sps:$4 sm:$0xff]  }
  0x54   :  { %v2362_v14 = vld [vmem:[#allocation5 + $0x18] ss:$12 sps:$4 sm:$0xff]   ;;  %v2365_v16 = vld [vmem:[#allocation5] ss:$12 sps:$4 sm:$0xff]   ;;  %v2367_v21 = vld [vmem:[#allocation11 + $0x30] sm:$0xff]   ;;  %v2741_v29 = vmov 0.0  }
  0x55   :  { %273 = vmatpush1.bf16.msra.mxu0 %v2347_v4  ;;  %v2363_v15 = vld [vmem:[#allocation5 + $0x4] ss:$12 sps:$4 sm:$0xff]   ;;  %v108_v18 = vld [vmem:[#allocation2 + $0x8] sm:$0xff]  ;;  %v2368_v22 = vld [vmem:[#allocation11 + $0x28] sm:$0xff]   ;;  %2231 = vmatprep.subr.bf16.mxu1 %v2741_v29  ;;  %vm2742_vm0 = vmmov 0   ;;  %v361_v41 = vshrl.u32 %v360_v39, 7 }
  0x56   :  { %274 = vmatprep.subr.bf16.mxu0 %v2348_v5  ;;  %v2366_v19 = vld [vmem:[#allocation11 + $0x38] sm:$0xff]   ;;  %v109_v20 = vpack.c.bf16 %v108_v18, %v107_v17  ;;  %v2369_v23 = vld [vmem:[#allocation11 + $0x20] sm:$0xff]   ;;  %v2371_v25 = vld [vmem:[#allocation11 + $0x10] sm:$0xff]   ;;  %2247 = vmatprep.mubr.msk.bf16.mxu1 %vm2742_vm0, %v2741_v29  ;;  %v2743_v37 = vmov 1966171168   ;;  %vm1167_vm1 = vcmask 1041409  }
  0x57   :  { %v2370_v24 = vld [vmem:[#allocation11 + $0x18] sm:$0xff]   ;;  %v2372_v26 = vld [vmem:[#allocation11 + $0x8] sm:$0xff]   ;;  %v2373_v27 = vld [vmem:[#allocation11] sm:$0xff]   ;;  %v358_v38 = vunpack.c.l.s4 %v2743_v37  ;;  %v2815_v50 = vsub.s32 0, %v361_v41  ;;  %vm1169_vm2 = vcmask 1042434   ;;  %vm1171_vm3 = vcmask 1043459  }
  0x58   :  { %v2374_v28 = vld [vmem:[#allocation5 + $0xb0] ss:$12 sps:$4 sm:$0xff]   ;;  %v2375_v30 = vld [vmem:[#allocation5 + $0x98] ss:$12 sps:$4 sm:$0xff]   ;;  %v2376_v31 = vld [vmem:[#allocation5 + $0x80] ss:$12 sps:$4 sm:$0xff]  }
  0x59   :  { %275 = vmatpush1.bf16.msra.mxu0 %v2350_v6  ;;  %2232 = vmatpush3.bf16.msra.mxu1 %v2374_v28  ;;  %v2377_v32 = vld [vmem:[#allocation5 + $0x68] ss:$12 sps:$4 sm:$0xff]   ;;  %v2378_v33 = vld [vmem:[#allocation5 + $0x50] ss:$12 sps:$4 sm:$0xff]   ;;  %v2379_v34 = vld [vmem:[#allocation5 + $0x38] ss:$12 sps:$4 sm:$0xff]   ;;  %v359_v40 = vunpack.c.0.s8 %v358_v38 }
  0x5a   :  { %276 = vmatprep.subr.bf16.mxu0 %v2351_v7  ;;  %2233 = vmatprep.subr.bf16.mxu1 %v2741_v29  ;;  %v2380_v35 = vld [vmem:[#allocation5 + $0x20] ss:$12 sps:$4 sm:$0xff]   ;;  %v2381_v36 = vld [vmem:[#allocation5 + $0x8] ss:$12 sps:$4 sm:$0xff]   ;;  %vm1173_vm4 = vcmask 1044484   ;;  %vm1175_vm5 = vcmask 1045509  }
  0x5b   :  { %v362_v42 = vsub.s32 %v359_v40, %v361_v41  ;;  %vm1177_vm6 = vcmask 1046534   ;;  %vm1179_vm7 = vcmask 1047559   ;;  %s2744_s4 = smov [#allocation13]  }
  0x5c   :  { %s2033_s5 = sshll.u32 %s2744_s4, 4  ;;  %s2034_s5 = int_to_ptr.vmem [resolvable:$true] %s2033_s5 }
  0x5d   :  { %277 = vmatpush1.bf16.msra.mxu0 %v2353_v8  ;;  %2234 = vmatpush3.bf16.msra.mxu1 %v2375_v30  ;;  %s2696_s7 = scalar_lea.vmem %s2034_s5, 256  ;;  %p2701_p3 = scmp.lt.s32.totalorder %s2034_s5, %s2034_s5 }
  0x5e   :  { %278 = vmatprep.subr.bf16.mxu0 %v2354_v9  ;;  %2235 = vmatprep.subr.bf16.mxu1 %v2741_v29  ;;  %p2697_p2 = scmp.ne.s32.totalorder %s2034_s5, %s2696_s7  ;;  %p2702_p4 = scmp.lt.s32.totalorder %s2696_s7, %s2696_s7 }
  0x60   :  { %p2703_p5 = por %p2702_p4, %p2701_p3 }
  0x61   :  { %279 = vmatpush1.bf16.msra.mxu0 %v2356_v10  ;;  %2236 = vmatpush3.bf16.msra.mxu1 %v2376_v31 }
  0x62   :  { %280 = vmatprep.subr.bf16.mxu0 %v2357_v11  ;;  %2237 = vmatprep.subr.bf16.mxu1 %v2741_v29  ;;  %p2704_p6 = pnand %p2703_p5, %p2697_p2 }
  0x65   :  { %281 = vmatpush1.bf16.msra.mxu0 %v2359_v12  ;;  %2238 = vmatpush3.bf16.msra.mxu1 %v2377_v32 }
  0x66   :  { %282 = vmatprep.subr.bf16.mxu0 %v2360_v13  ;;  %2239 = vmatprep.subr.bf16.mxu1 %v2741_v29 }
  0x69   :  { %283 = vmatpush1.bf16.msra.mxu0 %v2362_v14  ;;  %2240 = vmatpush3.bf16.msra.mxu1 %v2378_v33 }
  0x6a   :  { %284 = vmatprep.subr.bf16.mxu0 %v2363_v15  ;;  %2241 = vmatprep.subr.bf16.mxu1 %v2741_v29 }
  0x6d   :  { %285 = vmatpush1.bf16.msra.mxu0 %v2365_v16  ;;  %2242 = vmatpush3.bf16.msra.mxu1 %v2379_v34 }
  0x6e   :  { %2251 = vmatprep.subr.bf16.mxu0 %v2366_v19  ;;  %2243 = vmatprep.subr.bf16.mxu1 %v2741_v29 }
  0x70   :  { %303 = vmatmul.mubr.bf16.vlgmr.msra.gmra.mxu0 %v109_v20 }
  0x71   :  { %2252 = vmatpush3.bf16.msra.mxu0 %v2366_v19  ;;  %2244 = vmatpush3.bf16.msra.mxu1 %v2380_v35 }
  0x72   :  { %2253 = vmatprep.subr.bf16.mxu0 %v2367_v21  ;;  %2245 = vmatprep.subr.bf16.mxu1 %v2741_v29 }
  0x75   :  { %2254 = vmatpush3.bf16.msra.mxu0 %v2367_v21  ;;  %2246 = vmatpush3.bf16.msra.mxu1 %v2381_v36 }
  0x76   :  { %2255 = vmatprep.subr.bf16.mxu0 %v2368_v22  ;;  %2283 = vmatprep.subr.bf16.mxu1 %v2741_v29 }
  0x78   :  { %2248 = vmatmul.mubr.bf16.vlgmr.msra.gmra.mxu1 %v109_v20 }
  0x79   :  { %2256 = vmatpush3.bf16.msra.mxu0 %v2368_v22  ;;  %2299 = vmatprep.mubr.msk.bf16.mxu1 %vm2742_vm0, %v2741_v29 }
  0x7a   :  { %2257 = vmatprep.subr.bf16.mxu0 %v2369_v23 }
  0x7d   :  { %2258 = vmatpush3.bf16.msra.mxu0 %v2369_v23 }
  0x7e   :  { %2259 = vmatprep.subr.bf16.mxu0 %v2370_v24 }
  0x81   :  { %2260 = vmatpush3.bf16.msra.mxu0 %v2370_v24 }
  0x82   :  { %2261 = vmatprep.subr.bf16.mxu0 %v2371_v25 }
  0x85   :  { %2262 = vmatpush3.bf16.msra.mxu0 %v2371_v25 }
  0x86   :  { %2263 = vmatprep.subr.bf16.mxu0 %v2372_v26 }
  0x89   :  { %2264 = vmatpush3.bf16.msra.mxu0 %v2372_v26 }
  0x8a   :  { %2265 = vmatprep.subr.bf16.mxu0 %v2373_v27 }
  0x8d   :  { %2266 = vmatpush3.bf16.msra.mxu0 %v2373_v27 }
 0x130   :  { %v304_v43 = vpop.f32.mrf.mxu0 }
 0x131   :  { %v356_v44 = vcombine.high %v304_v43, %v304_v43  ;;  %v363_v45 = vrot.slane %v304_v43, %v362_v42 }
 0x132   :  { %v306_v46 = vpop.f32.mrf.mxu0 }
 0x133   :  { %v370_v47 = vrot.slane %v356_v44, %v362_v42  ;;  %v371_v48 = vcombine.high %v363_v45, %v363_v45  ;;  %v379_v49 = vrot.slane %v363_v45, %v362_v42 }
 0x134   :  { %v308_v51 = vpop.f32.mrf.mxu0 }
 0x135   :  { %v372_v52 = vcombine.high %v370_v47, %v370_v47  ;;  %v393_v53 = vrot.slane %v371_v48, %v362_v42  ;;  %v401_v54 = vcombine.high %v379_v49, %v379_v49  ;;  %v405_v55 = vcombine.high %v308_v51, %v308_v51 }
 0x136   :  { %v412_v56 = vrot.slane %v308_v51, %v362_v42  ;;  %v457_v59 = vrot.slane %v379_v49, %v2815_v50  ;;  %v386_v61 = vrot.slane %v370_v47, %v362_v42  ;;  %v310_v23 = vpop.f32.mrf.mxu0 }
 0x137   :  { %v400_v57 = vrot.slane %v372_v52, %v362_v42  ;;  %v403_v58 = vcombine.high %v393_v53, %v393_v53  ;;  %v461_v60 = vrot.slane %v393_v53, %v2815_v50  ;;  %v465_v62 = vrot.slane %v401_v54, %v2815_v50 }
 0x138   :  { %v420_v63 = vcombine.high %v412_v56, %v412_v56  ;;  %v419_v3 = vrot.slane %v405_v55, %v362_v42  ;;  %v534_v6 = vmul.f32 %v457_v59, %v306_v46  ;;  %v402_v9 = vcombine.high %v386_v61, %v386_v61  ;;  %v2834_v53 = vpop.f32.mrf.mxu1  ;;  %v2385_v59 = vld [vmem:[#allocation7 + $0x20] sm:$0xff]  }
 0x139   :  { %v469_v1 = vrot.slane %v403_v58, %v2815_v50  ;;  %v404_v2 = vcombine.high %v400_v57, %v400_v57  ;;  %v535_v4 = vmul.f32 %v461_v60, %v306_v46  ;;  %v536_v7 = vmul.f32 %v465_v62, %v306_v46  ;;  %v2383_v58 = vld [vmem:[#allocation7 + $0x30] sm:$0xff]   ;;  %v2386_v60 = vld [vmem:[#allocation7 + $0x18] sm:$0xff]   ;;  %v2388_v62 = vld [vmem:[#allocation7 + $0x8] sm:$0xff]  }
 0x13a   :  { %v442_v5 = vrot.slane %v420_v63, %v362_v42  ;;  %v473_v10 = vrot.slane %v386_v61, %v2815_v50  ;;  %v428_v11 = vrot.slane %v412_v56, %v362_v42  ;;  %v477_v14 = vrot.slane %v400_v57, %v2815_v50  ;;  %v2249_v54 = vpop.f32.mrf.mxu1  ;;  %v2382_v57 = vld [vmem:[#allocation7 + $0x38] sm:$0xff]   ;;  %v2387_v61 = vld [vmem:[#allocation7 + $0x10] sm:$0xff]   ;;  %v2389_v63 = vld [vmem:[#allocation7] sm:$0xff]  }
 0x13b   :  { %v537_v8 = vmul.f32 %v469_v1, %v306_v46  ;;  %v550_v12 = vpack.c.bf16 %v535_v4, %v534_v6  ;;  %v421_v15 = vcombine.high %v419_v3, %v419_v3  ;;  %v485_v17 = vrot.slane %v404_v2, %v2815_v50  ;;  %2284 = vmatpush3.bf16.msra.mxu1 %v2382_v57  ;;  %v2390_v2 = vld [vmem:[#allocation8 + $0x150] ss:$24 sps:$4 sm:$0xff]  }
 0x13c   :  { %v493_v16 = vrot.slane %v442_v5, %v2815_v50  ;;  %v538_v18 = vmul.f32 %v473_v10, %v306_v46  ;;  %v539_v19 = vmul.f32 %v477_v14, %v306_v46  ;;  %v481_v20 = vrot.slane %v402_v9, %v2815_v50  ;;  %v2836_v55 = vpop.f32.mrf.mxu1  ;;  %2285 = vmatprep.subr.bf16.mxu1 %v2741_v29  ;;  %v2396_v10 = vld [vmem:[#allocation8 + $0x120] ss:$24 sps:$4 sm:$0xff]   ;;  %v2414_v54 = vld [vmem:[#allocation8 + $0x90] ss:$24 sps:$4 sm:$0xff]  }
 0x13d   :  { %v551_v13 = vpack.c.bf16 %v537_v8, %v536_v7  ;;  %2267 = vmatprep.mubr.bf16.mxu0 %v550_v12  ;;  %v489_v21 = vrot.slane %v428_v11, %v2815_v50  ;;  %v452_v22 = vcombine.high %v442_v5, %v442_v5  ;;  %v541_v25 = vmul.f32 %v485_v17, %v306_v46  ;;  %v2395_v5 = vld [vmem:[#allocation8 + $0x15c] ss:$24 sps:$4 sm:$0xff]  }
 0x13e   :  { %v552_v24 = vpack.c.bf16 %v539_v19, %v538_v18  ;;  %v449_v26 = vrot.slane %v421_v15, %v362_v42  ;;  %v543_v27 = vmul.f32 %v493_v16, %v310_v23  ;;  %v450_v28 = vcombine.high %v428_v11, %v428_v11  ;;  %v2250_v56 = vpop.f32.mrf.mxu1  ;;  %v2398_v7 = vld [vmem:[#allocation8 + $0x124] ss:$24 sps:$4 sm:$0xff]   ;;  %v2404_v15 = vld [vmem:[#allocation8 + $0xf4] ss:$24 sps:$4 sm:$0xff]  }
 0x13f   :  { %2268 = vmatmul.mubr.bf16.vlgmr.msra.gmra.mxu0 %v551_v13  ;;  %v540_v30 = vmul.f32 %v481_v20, %v306_v46  ;;  %v435_v31 = vrot.slane %v419_v3, %v362_v42  ;;  %v542_v32 = vmul.f32 %v489_v21, %v310_v23  ;;  %v501_v34 = vrot.slane %v452_v22, %v2815_v50  ;;  %v2392_v3 = vld [vmem:[#allocation8 + $0x154] ss:$24 sps:$4 sm:$0xff]   ;;  %v2402_v21 = vld [vmem:[#allocation8 + $0xf0] ss:$24 sps:$4 sm:$0xff]  }
 0x140   :  { %2271 = vmatprep.mubr.bf16.mxu0 %v552_v24  ;;  %v509_v36 = vrot.slane %v449_v26, %v2815_v50  ;;  %v497_v37 = vrot.slane %v450_v28, %v2815_v50  ;;  %v453_v39 = vcombine.high %v449_v26, %v449_v26  ;;  %2286 = vmatpush3.bf16.msra.mxu1 %v2383_v58 }
 0x141   :  { %v553_v33 = vpack.c.bf16 %v541_v25, %v540_v30  ;;  %v554_v35 = vpack.c.bf16 %v543_v27, %v542_v32  ;;  %v505_v38 = vrot.slane %v435_v31, %v2815_v50  ;;  %v545_v40 = vmul.f32 %v501_v34, %v310_v23  ;;  %2287 = vmatprep.subr.bf16.mxu1 %v2741_v29  ;;  %v2410_v27 = vld [vmem:[#allocation8 + $0xc4] ss:$24 sps:$4 sm:$0xff]  }
 0x142   :  { %v547_v41 = vmul.f32 %v509_v36, %v310_v23  ;;  %v451_v43 = vcombine.high %v435_v31, %v435_v31  ;;  %v544_v44 = vmul.f32 %v497_v37, %v310_v23  ;;  %v517_v46 = vrot.slane %v453_v39, %v2815_v50  ;;  %1570 = vmatprep.subr.bf16.mxu0 %v2392_v3 }
 0x143   :  { %v546_v45 = vmul.f32 %v505_v38, %v310_v23  ;;  %1571 = vmatpush1.bf16.msra.mxu0 %v2390_v2 }
 0x144   :  { %v555_v42 = vpack.c.bf16 %v545_v40, %v544_v44  ;;  %v513_v48 = vrot.slane %v451_v43, %v2815_v50  ;;  %v549_v49 = vmul.f32 %v517_v46, %v310_v23  ;;  %v2384_v50 = vld [vmem:[#allocation7 + $0x28] sm:$0xff]   ;;  %1572 = vmatprep.subr.bf16.mxu0 %v2398_v7 }
 0x145   :  { %v556_v47 = vpack.c.bf16 %v547_v41, %v546_v45  ;;  %2288 = vmatpush3.bf16.msra.mxu1 %v2384_v50  ;;  %v2416_v44 = vld [vmem:[#allocation8 + $0x94] ss:$24 sps:$4 sm:$0xff]  }
 0x146   :  { %v548_v51 = vmul.f32 %v513_v48, %v310_v23  ;;  %2289 = vmatprep.subr.bf16.mxu1 %v2741_v29 }
 0x147   :  { %2272 = vmatmul.mubr.bf16.gmra.mxu0 %v553_v33 }
 0x148   :  { %2275 = vmatprep.mubr.bf16.mxu0 %v554_v35  ;;  %v557_v52 = vpack.c.bf16 %v549_v49, %v548_v51  ;;  %1573 = vmatpush1.bf16.msra.mxu0 %v2396_v10  ;;  %v2408_v35 = vld [vmem:[#allocation8 + $0xc0] ss:$24 sps:$4 sm:$0xff]  }
 0x149   :  { %2290 = vmatpush3.bf16.msra.mxu1 %v2385_v59  ;;  %1574 = vmatprep.subr.bf16.mxu0 %v2404_v15 }
 0x14a   :  { %2291 = vmatprep.subr.bf16.mxu1 %v2741_v29 }
 0x14c   :  { %1575 = vmatpush1.bf16.msra.mxu0 %v2402_v21 }
 0x14d   :  { %2292 = vmatpush3.bf16.msra.mxu1 %v2386_v60  ;;  %1576 = vmatprep.subr.bf16.mxu0 %v2410_v27 }
 0x14e   :  { %2293 = vmatprep.subr.bf16.mxu1 %v2741_v29 }
 0x14f   :  { %2276 = vmatmul.mubr.bf16.gmra.mxu0 %v555_v42 }
 0x150   :  { %2279 = vmatprep.mubr.bf16.mxu0 %v556_v47  ;;  %1577 = vmatpush1.bf16.msra.mxu0 %v2408_v35 }
 0x151   :  { %2294 = vmatpush3.bf16.msra.mxu1 %v2387_v61  ;;  %1578 = vmatprep.subr.bf16.mxu0 %v2416_v44 }
 0x152   :  { %2295 = vmatprep.subr.bf16.mxu1 %v2741_v29 }
 0x154   :  { %1579 = vmatpush1.bf16.msra.mxu0 %v2414_v54 }
 0x155   :  { %2296 = vmatpush3.bf16.msra.mxu1 %v2388_v62 }
 0x156   :  { %2297 = vmatprep.subr.bf16.mxu1 %v2741_v29 }
 0x157   :  { %2280 = vmatmul.mubr.bf16.gmra.mxu0 %v557_v52 }
 0x158   :  { %1602 = vmatprep.mubr.bf16.mxu0 %v2740_v0 }
 0x159   :  { %2298 = vmatpush3.bf16.msra.mxu1 %v2389_v63  ;;  %v2422_v63 = vld [vmem:[#allocation8 + $0x64] ss:$24 sps:$4 sm:$0xff]  }
 0x15a   :  { %1613 = vmatprep.subr.bf16.mxu1 %v2395_v5  ;;  %1580 = vmatprep.subr.bf16.mxu0 %v2422_v63 }
 0x1ff   :  { %v2269_v1 = vpop.f32.mrf.mxu0 }
 0x200   :  { %v731_v4 = vrot.slane %v2269_v1, 4 }
 0x201   :  { %v656_v6 = vpop.f32.mrf.mxu0 }
 0x202   :  { %v732_v8 = vmax.f32 %v2269_v1, %v731_v4  ;;  %v719_v9 = vrot.slane %v656_v6, 4 }
 0x203   :  { %v2845_v11 = vpop.f32.mrf.mxu0 }
 0x204   :  { %v733_v12 = vrot.slane %v732_v8, 2  ;;  %v720_v13 = vmax.f32 %v656_v6, %v719_v9  ;;  %v737_v14 = vrot.slane %v2845_v11, 4  ;;  %v2420_v9 = vld [vmem:[#allocation8 + $0x60] ss:$24 sps:$4 sm:$0xff]  }
 0x205   :  { %v2848_v16 = vpop.f32.mrf.mxu0  ;;  %1581 = vmatpush1.bf16.msra.mxu0 %v2420_v9 }
 0x206   :  { %v734_v17 = vmax.f32 %v732_v8, %v733_v12  ;;  %v721_v18 = vrot.slane %v720_v13, 2  ;;  %v738_v19 = vmax.f32 %v2845_v11, %v737_v14  ;;  %v725_v20 = vrot.slane %v2848_v16, 4 }
 0x207   :  { %v2852_v22 = vpop.f32.mrf.mxu0 }
 0x208   :  { %v735_v23 = vrot.slane %v734_v17, 1  ;;  %v722_v24 = vmax.f32 %v720_v13, %v721_v18  ;;  %v739_v25 = vrot.slane %v738_v19, 2  ;;  %v726_v26 = vmax.f32 %v2848_v16, %v725_v20 }
 0x209   :  { %v755_v28 = vrot.slane %v2852_v22, 4  ;;  %v2856_v30 = vpop.f32.mrf.mxu0 }
 0x20a   :  { %v736_v31 = vmax.f32 %v734_v17, %v735_v23  ;;  %v723_v32 = vrot.slane %v722_v24, 1  ;;  %v740_v33 = vmax.f32 %v738_v19, %v739_v25  ;;  %v727_v34 = vrot.slane %v726_v26, 2 }
 0x20b   :  { %v756_v36 = vmax.f32 %v2852_v22, %v755_v28  ;;  %v743_v37 = vrot.slane %v2856_v30, 4  ;;  %v2860_v38 = vpop.f32.mrf.mxu0 }
 0x20c   :  { %v817_v39 = vsub.f32 %v2269_v1, %v736_v31  ;;  %v724_v40 = vmax.f32 %v722_v24, %v723_v32  ;;  %v741_v41 = vrot.slane %v740_v33, 1  ;;  %v728_v43 = vmax.f32 %v726_v26, %v727_v34 }
 0x20d   :  { %v757_v45 = vrot.slane %v756_v36, 2  ;;  %v744_v42 = vmax.f32 %v2856_v30, %v743_v37  ;;  %v761_v46 = vrot.slane %v2860_v38, 4  ;;  %v2864_v47 = vpop.f32.mrf.mxu0 }
 0x20e   :  { %v835_v48 = vmul.f32 1.442695, %v817_v39  ;;  %v815_v49 = vsub.f32 %v656_v6, %v724_v40  ;;  %v742_v51 = vmax.f32 %v740_v33, %v741_v41  ;;  %v729_v52 = vrot.slane %v728_v43, 1 }
 0x20f   :  { %v758_v56 = vmax.f32 %v756_v36, %v757_v45  ;;  %v745_v57 = vrot.slane %v744_v42, 2  ;;  %v762_v58 = vmax.f32 %v2860_v38, %v761_v46  ;;  %v749_v50 = vrot.slane %v2864_v47, 4  ;;  %v2868_v59 = vpop.f32.mrf.mxu0 }
 0x210   :  { %2486 = vpow2.f32 %v835_v48  ;;  %v831_v60 = vmul.f32 1.442695, %v815_v49  ;;  %v818_v61 = vsub.f32 %v2845_v11, %v742_v51  ;;  %v730_v62 = vmax.f32 %v728_v43, %v729_v52 }
 0x211   :  { %v759_v1 = vrot.slane %v758_v56, 1  ;;  %v746_v2 = vmax.f32 %v744_v42, %v745_v57  ;;  %v763_v3 = vrot.slane %v762_v58, 2  ;;  %v750_v4 = vmax.f32 %v2864_v47, %v749_v50  ;;  %v2872_v5 = vpop.f32.mrf.mxu0 }
 0x212   :  { %2488 = vpow2.f32 %v831_v60  ;;  %v837_v6 = vmul.f32 1.442695, %v818_v61  ;;  %v816_v7 = vsub.f32 %v2848_v16, %v730_v62  ;;  %v779_v8 = vrot.slane %v2868_v59, 4 }
 0x213   :  { %v760_v10 = vmax.f32 %v758_v56, %v759_v1  ;;  %v747_v12 = vrot.slane %v746_v2, 1  ;;  %v764_v11 = vmax.f32 %v762_v58, %v763_v3  ;;  %v751_v13 = vrot.slane %v750_v4, 2  ;;  %v2876_v14 = vpop.f32.mrf.mxu0 }
 0x214   :  { %2490 = vpow2.f32 %v837_v6  ;;  %v833_v15 = vmul.f32 1.442695, %v816_v7  ;;  %v780_v17 = vmax.f32 %v2868_v59, %v779_v8  ;;  %v767_v18 = vrot.slane %v2872_v5, 4 }
 0x215   :  { %v821_v19 = vsub.f32 %v2852_v22, %v760_v10  ;;  %v748_v16 = vmax.f32 %v746_v2, %v747_v12  ;;  %v765_v20 = vrot.slane %v764_v11, 1  ;;  %v752_v21 = vmax.f32 %v750_v4, %v751_v13  ;;  %v2881_v23 = vpop.f32.mrf.mxu0 }
 0x216   :  { %2492 = vpow2.f32 %v833_v15  ;;  %v781_v24 = vrot.slane %v780_v17, 2  ;;  %v768_v25 = vmax.f32 %v2872_v5, %v767_v18  ;;  %v785_v26 = vrot.slane %v2876_v14, 4 }
 0x217   :  { %v843_v27 = vmul.f32 1.442695, %v821_v19  ;;  %v819_v28 = vsub.f32 %v2856_v30, %v748_v16  ;;  %v766_v31 = vmax.f32 %v764_v11, %v765_v20  ;;  %v753_v32 = vrot.slane %v752_v21, 1  ;;  %v2886_v33 = vpop.f32.mrf.mxu0 }
 0x218   :  { %v782_v22 = vmax.f32 %v780_v17, %v781_v24  ;;  %v769_v34 = vrot.slane %v768_v25, 2  ;;  %v786_v35 = vmax.f32 %v2876_v14, %v785_v26  ;;  %v773_v36 = vrot.slane %v2881_v23, 4 }
 0x219   :  { %2494 = vpow2.f32 %v843_v27  ;;  %v839_v37 = vmul.f32 1.442695, %v819_v28  ;;  %v822_v39 = vsub.f32 %v2860_v38, %v766_v31  ;;  %v754_v40 = vmax.f32 %v752_v21, %v753_v32  ;;  %v2892_v45 = vpop.f32.mrf.mxu0 }
 0x21a   :  { %v783_v41 = vrot.slane %v782_v22, 1  ;;  %v770_v43 = vmax.f32 %v768_v25, %v769_v34  ;;  %v787_v44 = vrot.slane %v786_v35, 2  ;;  %v774_v30 = vmax.f32 %v2881_v23, %v773_v36 }
 0x21b   :  { %2496 = vpow2.f32 %v839_v37  ;;  %v845_v42 = vmul.f32 1.442695, %v822_v39  ;;  %v820_v46 = vsub.f32 %v2864_v47, %v754_v40  ;;  %v803_v48 = vrot.slane %v2886_v33, 4  ;;  %v2913_v19 = vpop.f32.mrf.mxu0 }
 0x21c   :  { %v784_v49 = vmax.f32 %v782_v22, %v783_v41  ;;  %v771_v51 = vrot.slane %v770_v43, 1  ;;  %v788_v52 = vmax.f32 %v786_v35, %v787_v44  ;;  %v775_v54 = vrot.slane %v774_v30, 2 }
 0x21d   :  { %v2896_v56 = vpop.eup %2486  ;;  %2498 = vpow2.f32 %v845_v42  ;;  %v841_v38 = vmul.f32 1.442695, %v820_v46  ;;  %v804_v57 = vmax.f32 %v2886_v33, %v803_v48  ;;  %v791_v58 = vrot.slane %v2892_v45, 4  ;;  %v2924_v34 = vpop.f32.mrf.mxu0 }
 0x21e   :  { %v825_v50 = vsub.f32 %v2868_v59, %v784_v49  ;;  %v772_v60 = vmax.f32 %v770_v43, %v771_v51  ;;  %v789_v61 = vrot.slane %v788_v52, 1  ;;  %v776_v47 = vmax.f32 %v774_v30, %v775_v54 }
 0x21f   :  { %v2901_v62 = vpop.eup %2488  ;;  %2500 = vpow2.f32 %v841_v38  ;;  %v805_v63 = vrot.slane %v804_v57, 2  ;;  %v792_v1 = vmax.f32 %v2892_v45, %v791_v58  ;;  %v875_v2 = vrot.slane %v2896_v56, 4 }
 0x220   :  { %v863_v3 = vrot.slane %v2901_v62, 4  ;;  %v851_v4 = vmul.f32 1.442695, %v825_v50  ;;  %v823_v6 = vsub.f32 %v2872_v5, %v772_v60  ;;  %v790_v8 = vmax.f32 %v788_v52, %v789_v61 }
 0x221   :  { %v2907_v7 = vpop.eup %2490  ;;  %v777_v59 = vrot.slane %v776_v47, 1  ;;  %v806_v9 = vmax.f32 %v804_v57, %v805_v63  ;;  %v793_v12 = vrot.slane %v792_v1, 2  ;;  %v876_v5 = vadd.f32 %v2896_v56, %v875_v2 }
 0x222   :  { %v864_v10 = vadd.f32 %v2901_v62, %v863_v3  ;;  %2502 = vpow2.f32 %v851_v4  ;;  %v847_v13 = vmul.f32 1.442695, %v823_v6  ;;  %v826_v15 = vsub.f32 %v2876_v14, %v790_v8 }
 0x223   :  { %v2910_v11 = vpop.eup %2492  ;;  %v778_v17 = vmax.f32 %v776_v47, %v777_v59  ;;  %v807_v18 = vrot.slane %v806_v9, 1  ;;  %v881_v16 = vrot.slane %v2907_v7, 4  ;;  %v794_v28 = vmax.f32 %v792_v1, %v793_v12 }
 0x224   :  { %v869_v20 = vrot.slane %v2910_v11, 4  ;;  %2504 = vpow2.f32 %v847_v13  ;;  %v853_v21 = vmul.f32 1.442695, %v826_v15  ;;  %v865_v27 = vrot.slane %v864_v10, 2 }
 0x225   :  { %v824_v24 = vsub.f32 %v2881_v23, %v778_v17  ;;  %v808_v25 = vmax.f32 %v806_v9, %v807_v18  ;;  %v877_v36 = vrot.slane %v876_v5, 2  ;;  %v882_v23 = vadd.f32 %v2907_v7, %v881_v16 }
 0x226   :  { %v2919_v26 = vpop.eup %2494  ;;  %v870_v14 = vadd.f32 %v2910_v11, %v869_v20  ;;  %2506 = vpow2.f32 %v853_v21  ;;  %v795_v37 = vrot.slane %v794_v28, 1  ;;  %v809_v39 = vrot.slane %v2913_v19, 4 }
 0x227   :  { %v899_v31 = vrot.slane %v2919_v26, 4  ;;  %v849_v32 = vmul.f32 1.442695, %v824_v24  ;;  %v829_v22 = vsub.f32 %v2886_v33, %v808_v25  ;;  %v866_v30 = vadd.f32 %v865_v27, %v864_v10 }
 0x228   :  { %v2926_v35 = vpop.eup %2496  ;;  %v871_v40 = vrot.slane %v870_v14, 2  ;;  %v796_v42 = vmax.f32 %v794_v28, %v795_v37  ;;  %v810_v33 = vmax.f32 %v2913_v19, %v809_v39  ;;  %v797_v46 = vrot.slane %v2924_v34, 4 }
 0x229   :  { %v887_v41 = vrot.slane %v2926_v35, 4  ;;  %2508 = vpow2.f32 %v849_v32  ;;  %v859_v43 = vmul.f32 1.442695, %v829_v22  ;;  %v900_v48 = vadd.f32 %v2919_v26, %v899_v31 }
 0x22a   :  { %v2931_v44 = vpop.eup %2498  ;;  %v878_v54 = vadd.f32 %v877_v36, %v876_v5  ;;  %v827_v38 = vsub.f32 %v2892_v45, %v796_v42  ;;  %v811_v57 = vrot.slane %v810_v33, 2  ;;  %v798_v58 = vmax.f32 %v2924_v34, %v797_v46 }
 0x22b   :  { %v888_v49 = vadd.f32 %v2926_v35, %v887_v41  ;;  %v905_v51 = vrot.slane %v2931_v44, 4  ;;  %2510 = vpow2.f32 %v859_v43  ;;  %v883_v50 = vrot.slane %v882_v23, 2 }
 0x22c   :  { %v2938_v52 = vpop.eup %2500  ;;  %v872_v60 = vadd.f32 %v871_v40, %v870_v14  ;;  %v855_v1 = vmul.f32 1.442695, %v827_v38  ;;  %v812_v2 = vmax.f32 %v810_v33, %v811_v57  ;;  %v799_v3 = vrot.slane %v798_v58, 2 }
 0x22d   :  { %v906_v61 = vadd.f32 %v2931_v44, %v905_v51  ;;  %v893_v47 = vrot.slane %v2938_v52, 4  ;;  %v889_v63 = vrot.slane %v888_v49, 2  ;;  %v901_v6 = vrot.slane %v900_v48, 2 }
 0x22e   :  { %v867_v45 = vrot.slane %v866_v30, 1  ;;  %2512 = vpow2.f32 %v855_v1  ;;  %v813_v10 = vrot.slane %v812_v2, 1  ;;  %v800_v12 = vmax.f32 %v798_v58, %v799_v3 }
 0x22f   :  { %v2944_v4 = vpop.eup %2502  ;;  %v907_v8 = vrot.slane %v906_v61, 2  ;;  %v894_v59 = vadd.f32 %v2938_v52, %v893_v47  ;;  %v884_v13 = vadd.f32 %v883_v50, %v882_v23  ;;  %v873_v17 = vrot.slane %v872_v60, 1 }
 0x230   :  { %v923_v9 = vrot.slane %v2944_v4, 4  ;;  %v890_v5 = vadd.f32 %v889_v63, %v888_v49  ;;  %v814_v16 = vmax.f32 %v812_v2, %v813_v10  ;;  %v801_v20 = vrot.slane %v800_v12, 1 }
 0x231   :  { %v895_v15 = vrot.slane %v894_v59, 2  ;;  %v2948_v18 = vpop.eup %2504  ;;  %v879_v21 = vrot.slane %v878_v54, 1  ;;  %v902_v24 = vadd.f32 %v901_v6, %v900_v48  ;;  %v868_v14 = vadd.f32 %v867_v45, %v866_v30 }
 0x232   :  { %v924_v25 = vadd.f32 %v2944_v4, %v923_v9  ;;  %v911_v27 = vrot.slane %v2948_v18, 4  ;;  %v908_v31 = vadd.f32 %v907_v8, %v906_v61  ;;  %v830_v22 = vsub.f32 %v2913_v19, %v814_v16 }
 0x233   :  { %v2952_v28 = vpop.eup %2506  ;;  %v896_v32 = vadd.f32 %v895_v15, %v894_v59  ;;  %v802_v36 = vmax.f32 %v800_v12, %v801_v20  ;;  %v874_v39 = vadd.f32 %v873_v17, %v872_v60  ;;  %v885_v40 = vrot.slane %v884_v13, 1 }
 0x234   :  { %v912_v23 = vadd.f32 %v2948_v18, %v911_v27  ;;  %v929_v37 = vrot.slane %v2952_v28, 4  ;;  %v861_v43 = vmul.f32 1.442695, %v830_v22  ;;  %v880_v33 = vadd.f32 %v879_v21, %v878_v54 }
 0x235   :  { %v828_v42 = vsub.f32 %v2924_v34, %v802_v36  ;;  %v891_v30 = vrot.slane %v890_v5, 1  ;;  %v925_v46 = vrot.slane %v924_v25, 2  ;;  %v897_v57 = vrot.slane %v896_v32, 1 }
 0x236   :  { %v2957_v41 = vpop.eup %2508  ;;  %v913_v48 = vrot.slane %v912_v23, 2  ;;  %v930_v49 = vadd.f32 %v2952_v28, %v929_v37  ;;  %2514 = vpow2.f32 %v861_v43  ;;  %v903_v58 = vrot.slane %v902_v24, 1 }
 0x237   :  { %v917_v19 = vrot.slane %v2957_v41, 4  ;;  %v857_v38 = vmul.f32 1.442695, %v828_v42  ;;  %v886_v54 = vadd.f32 %v885_v40, %v884_v13  ;;  %v892_v47 = vadd.f32 %v891_v30, %v890_v5 }
 0x238   :  { %v2962_v51 = vpop.eup %2510  ;;  %v914_v50 = vadd.f32 %v913_v48, %v912_v23  ;;  %v931_v60 = vrot.slane %v930_v49, 2  ;;  %v909_v63 = vrot.slane %v908_v31, 1  ;;  %v926_v1 = vadd.f32 %v925_v46, %v924_v25 }
 0x239   :  { %v918_v61 = vadd.f32 %v2957_v41, %v917_v19  ;;  %v947_v34 = vrot.slane %v2962_v51, 4  ;;  %2516 = vpow2.f32 %v857_v38  ;;  %v898_v8 = vadd.f32 %v897_v57, %v896_v32 }
 0x23a   :  { %2518 = vrcp.f32 %v868_v14  ;;  %v932_v6 = vadd.f32 %v931_v60, %v930_v49  ;;  %v904_v59 = vadd.f32 %v903_v58, %v902_v24  ;;  %v915_v12 = vrot.slane %v914_v50, 1 }
 0x23b   :  { %v919_v2 = vrot.slane %v918_v61, 2  ;;  %v948_v3 = vadd.f32 %v2962_v51, %v947_v34  ;;  %2520 = vrcp.f32 %v874_v39  ;;  %v2967_v45 = vpop.eup %2512  ;;  %v910_v13 = vadd.f32 %v909_v63, %v908_v31 }
 0x23c   :  { %2522 = vrcp.f32 %v880_v33  ;;  %v935_v15 = vrot.slane %v2967_v45, 4  ;;  %v927_v16 = vrot.slane %v926_v1, 1  ;;  %v933_v21 = vrot.slane %v932_v6, 1 }
 0x23d   :  { %v920_v9 = vadd.f32 %v919_v2, %v918_v61  ;;  %v949_v10 = vrot.slane %v948_v3, 2  ;;  %2524 = vrcp.f32 %v886_v54  ;;  %v916_v24 = vadd.f32 %v915_v12, %v914_v50 }
 0x23e   :  { %2526 = vrcp.f32 %v892_v47  ;;  %v936_v20 = vadd.f32 %v2967_v45, %v935_v15  ;;  %v928_v32 = vadd.f32 %v927_v16, %v926_v1  ;;  %v934_v36 = vadd.f32 %v933_v21, %v932_v6 }
 0x23f   :  { %v950_v17 = vadd.f32 %v949_v10, %v948_v3  ;;  %v921_v5 = vrot.slane %v920_v9, 1  ;;  %2528 = vrcp.f32 %v898_v8 }
 0x240   :  { %2530 = vrcp.f32 %v904_v59  ;;  %v937_v27 = vrot.slane %v936_v20, 2 }
 0x241   :  { %v951_v25 = vrot.slane %v950_v17, 1  ;;  %2532 = vrcp.f32 %v910_v13  ;;  %v922_v14 = vadd.f32 %v921_v5, %v920_v9 }
 0x242   :  { %v938_v22 = vadd.f32 %v937_v27, %v936_v20  ;;  %2534 = vrcp.f32 %v916_v24 }
 0x243   :  { %v2971_v23 = vpop.eup %2514  ;;  %v952_v31 = vadd.f32 %v951_v25, %v950_v17  ;;  %2536 = vrcp.f32 %v922_v14 }
 0x244   :  { %v953_v37 = vrot.slane %v2971_v23, 4  ;;  %v939_v39 = vrot.slane %v938_v22, 1  ;;  %2538 = vrcp.f32 %v928_v32 }
 0x245   :  { %2540 = vrcp.f32 %v934_v36 }
 0x246   :  { %v2974_v40 = vpop.eup %2516  ;;  %v954_v42 = vadd.f32 %v2971_v23, %v953_v37  ;;  %v940_v30 = vadd.f32 %v939_v39, %v938_v22  ;;  %2542 = vrcp.f32 %v952_v31 }
 0x247   :  { %v2519_v43 = vpop.eup %2518  ;;  %v941_v33 = vrot.slane %v2974_v40, 4 }
 0x248   :  { %v2521_v46 = vpop.eup %2520  ;;  %v975_v48 = vmul.f32 %v2519_v43, %v2901_v62  ;;  %v955_v19 = vrot.slane %v954_v42, 2  ;;  %2544 = vrcp.f32 %v940_v30 }
 0x249   :  { %v2523_v49 = vpop.eup %2522  ;;  %v942_v38 = vadd.f32 %v2974_v40, %v941_v33  ;;  %v976_v57 = vmul.f32 %v2521_v46, %v2910_v11 }
 0x24a   :  { %v2525_v58 = vpop.eup %2524  ;;  %v977_v50 = vmul.f32 %v2523_v49, %v2896_v56  ;;  %v991_v60 = vmul.f32 %v975_v48, %v2834_v53  ;;  %v956_v11 = vadd.f32 %v955_v19, %v954_v42 }
 0x24b   :  { %v2527_v61 = vpop.eup %2526  ;;  %v943_v34 = vrot.slane %v942_v38, 2  ;;  %v978_v54 = vmul.f32 %v2525_v58, %v2907_v7  ;;  %v992_v47 = vmul.f32 %v976_v57, %v2834_v53 }
 0x24c   :  { %v2529_v62 = vpop.eup %2528  ;;  %v979_v63 = vmul.f32 %v2527_v61, %v2926_v35  ;;  %v993_v1 = vmul.f32 %v977_v50, %v2834_v53  ;;  %v1007_v2 = vrot.slane %v991_v60, 4  ;;  %v957_v33 = vrot.slane %v956_v11, 1 }
 0x24d   :  { %v2531_v3 = vpop.eup %2530  ;;  %v980_v6 = vmul.f32 %v2529_v62, %v2938_v52  ;;  %v994_v56 = vmul.f32 %v978_v54, %v2834_v53  ;;  %v1013_v8 = vrot.slane %v992_v47, 4  ;;  %v944_v15 = vadd.f32 %v943_v34, %v942_v38 }
 0x24e   :  { %v2533_v59 = vpop.eup %2532  ;;  %v981_v9 = vmul.f32 %v2531_v3, %v2919_v26  ;;  %v995_v7 = vmul.f32 %v979_v63, %v2834_v53  ;;  %v1008_v10 = vadd.f32 %v1007_v2, %v991_v60  ;;  %v1019_v12 = vrot.slane %v993_v1, 4 }
 0x24f   :  { %v996_v35 = vmul.f32 %v980_v6, %v2834_v53  ;;  %v1014_v13 = vadd.f32 %v1013_v8, %v992_v47  ;;  %v1025_v17 = vrot.slane %v994_v56, 4  ;;  %v982_v5 = vmul.f32 %v2533_v59, %v2931_v44  ;;  %v2535_v21 = vpop.eup %2534 }
 0x250   :  { %v1009_v16 = vrot.slane %v1008_v10, 2  ;;  %v1020_v20 = vadd.f32 %v1019_v12, %v993_v1  ;;  %v1031_v52 = vrot.slane %v995_v7, 4  ;;  %v997_v24 = vmul.f32 %v981_v9, %v2834_v53  ;;  %v2537_v27 = vpop.eup %2536 }
 0x251   :  { %v1015_v25 = vrot.slane %v1014_v13, 2  ;;  %v1026_v14 = vadd.f32 %v1025_v17, %v994_v56  ;;  %v1037_v32 = vrot.slane %v996_v35, 4  ;;  %v2539_v22 = vpop.eup %2538  ;;  %v945_v37 = vrot.slane %v944_v15, 1 }
 0x252   :  { %v1010_v26 = vadd.f32 %v1009_v16, %v1008_v10  ;;  %v1021_v31 = vrot.slane %v1020_v20, 2  ;;  %v2541_v39 = vpop.eup %2540  ;;  %v2995_v43 = vmul.f32 %v982_v5, %v2834_v53  ;;  %v1032_v42 = vadd.f32 %v1031_v52, %v995_v7 }
 0x253   :  { %v1016_v36 = vadd.f32 %v1015_v25, %v1014_v13  ;;  %v2543_v30 = vpop.eup %2542  ;;  %v1043_v48 = vrot.slane %v997_v24, 4  ;;  %v946_v49 = vadd.f32 %v945_v37, %v944_v15  ;;  %v983_v19 = vmul.f32 %v2535_v21, %v2948_v18 }
 0x254   :  { %v1011_v44 = vrot.slane %v1010_v26, 1  ;;  %v1027_v57 = vrot.slane %v1026_v14, 2  ;;  %v1038_v58 = vadd.f32 %v1037_v32, %v996_v35  ;;  %v958_v50 = vadd.f32 %v957_v33, %v956_v11 }
 0x255   :  { %v1017_v46 = vrot.slane %v1016_v36, 1  ;;  %v2545_v38 = vpop.eup %2544  ;;  %v984_v60 = vmul.f32 %v2537_v27, %v2957_v41  ;;  %v1022_v61 = vadd.f32 %v1021_v31, %v1020_v20  ;;  %2546 = vrcp.f32 %v946_v49 }
 0x256   :  { %v985_v53 = vmul.f32 %v2539_v22, %v2944_v4  ;;  %v986_v34 = vmul.f32 %v2541_v39, %v2952_v28  ;;  %v3001_v54 = vadd.f32 %v1011_v44, %v1010_v26  ;;  %2548 = vrcp.f32 %v958_v50 }
 0x257   :  { %v3003_v47 = vadd.f32 %v1017_v46, %v1016_v36  ;;  %v987_v62 = vmul.f32 %v2545_v38, %v2967_v45  ;;  %v989_v18 = vmul.f32 %v2543_v30, %v2962_v51  ;;  %v999_v63 = vmul.f32 %v983_v19, %v2836_v55 }
 0x258   :  { %v1000_v1 = vmul.f32 %v984_v60, %v2836_v55  ;;  %v1001_v41 = vmul.f32 %v985_v53, %v2836_v55  ;;  %v1028_v2 = vadd.f32 %v1027_v57, %v1026_v14  ;;  %v1033_v3 = vrot.slane %v1032_v42, 2 }
 0x259   :  { %v1002_v4 = vmul.f32 %v986_v34, %v2836_v55  ;;  %v1003_v28 = vmul.f32 %v987_v62, %v2836_v55  ;;  %v1023_v11 = vrot.slane %v1022_v61, 1  ;;  %v1055_v6 = vrot.slane %v999_v63, 4 }
 0x25a   :  { %v1061_v56 = vrot.slane %v1000_v1, 4  ;;  %v1067_v8 = vrot.slane %v1001_v41, 4  ;;  %v1103_v45 = vpack.c.bf16 %v3001_v54, %v3001_v54  ;;  %v1104_v51 = vpack.c.bf16 %v3003_v47, %v3003_v47 }
 0x25b   :  { %v1073_v59 = vrot.slane %v1002_v4, 4  ;;  %v1079_v9 = vrot.slane %v1003_v28, 4  ;;  %v1005_v7 = vmul.f32 %v989_v18, %v2836_v55  ;;  %v1056_v10 = vadd.f32 %v1055_v6, %v999_v63 }
 0x25c   :  { %v1062_v12 = vadd.f32 %v1061_v56, %v1000_v1  ;;  %v1068_v15 = vadd.f32 %v1067_v8, %v1001_v41  ;;  %v1034_v17 = vadd.f32 %v1033_v3, %v1032_v42  ;;  %v1039_v5 = vrot.slane %v1038_v58, 2 }
 0x25d   :  { %v1074_v35 = vadd.f32 %v1073_v59, %v1002_v4  ;;  %v1080_v13 = vadd.f32 %v1079_v9, %v1003_v28  ;;  %v1057_v16 = vrot.slane %v1056_v10, 2  ;;  %v1044_v21 = vadd.f32 %v1043_v48, %v997_v24 }
 0x25e   :  { %v1063_v20 = vrot.slane %v1062_v12, 2  ;;  %v1069_v52 = vrot.slane %v1068_v15, 2  ;;  %v1029_v26 = vrot.slane %v1028_v2, 1  ;;  %v1040_v14 = vadd.f32 %v1039_v5, %v1038_v58 }
 0x25f   :  { %v1075_v25 = vrot.slane %v1074_v35, 2  ;;  %v1081_v27 = vrot.slane %v1080_v13, 2  ;;  %v1058_v32 = vadd.f32 %v1057_v16, %v1056_v10  ;;  %v1045_v31 = vrot.slane %v1044_v21, 2 }
 0x260   :  { %v1064_v22 = vadd.f32 %v1063_v20, %v1062_v12  ;;  %v1070_v36 = vadd.f32 %v1069_v52, %v1068_v15  ;;  %v1035_v39 = vrot.slane %v1034_v17, 1  ;;  %v1041_v44 = vrot.slane %v1040_v14, 1 }
 0x261   :  { %v1076_v37 = vadd.f32 %v1075_v25, %v1074_v35  ;;  %v1049_v33 = vrot.slane %v2995_v43, 4  ;;  %v1059_v30 = vrot.slane %v1058_v32, 1  ;;  %v1046_v46 = vadd.f32 %v1045_v31, %v1044_v21 }
 0x262   :  { %v1065_v42 = vrot.slane %v1064_v22, 1  ;;  %v1082_v49 = vadd.f32 %v1081_v27, %v1080_v13  ;;  %v2547_v19 = vpop.eup %2546  ;;  %v1071_v38 = vrot.slane %v1070_v36, 1  ;;  %v1091_v24 = vrot.slane %v1005_v7, 4 }
 0x263   :  { %v1024_v48 = vadd.f32 %v1023_v11, %v1022_v61  ;;  %v1050_v57 = vadd.f32 %v1049_v33, %v2995_v43  ;;  %v2549_v58 = vpop.eup %2548  ;;  %v988_v50 = vmul.f32 %v2547_v19, %v2974_v40  ;;  %v1060_v60 = vadd.f32 %v1059_v30, %v1058_v32 }
 0x264   :  { %v1047_v53 = vrot.slane %v1046_v46, 1  ;;  %v1077_v34 = vrot.slane %v1076_v37, 1  ;;  %v990_v62 = vmul.f32 %v2549_v58, %v2971_v23  ;;  %v1066_v18 = vadd.f32 %v1065_v42, %v1064_v22 }
 0x265   :  { %v1030_v63 = vadd.f32 %v1029_v26, %v1028_v2  ;;  %v1051_v1 = vrot.slane %v1050_v57, 2  ;;  %v1004_v41 = vmul.f32 %v988_v50, %v2836_v55  ;;  %v1036_v3 = vadd.f32 %v1035_v39, %v1034_v17 }
 0x266   :  { %v1042_v4 = vadd.f32 %v1041_v44, %v1040_v14  ;;  %v1083_v28 = vrot.slane %v1082_v49, 1  ;;  %v1006_v61 = vmul.f32 %v990_v62, %v2836_v55  ;;  %v1072_v11 = vadd.f32 %v1071_v38, %v1070_v36 }
 0x267   :  { %v1052_v43 = vadd.f32 %v1051_v1, %v1050_v57  ;;  %v1092_v6 = vadd.f32 %v1091_v24, %v1005_v7  ;;  %v1085_v40 = vrot.slane %v1004_v41, 4  ;;  %v1111_v56 = vpack.c.bf16 %v1060_v60, %v1060_v60 }
 0x268   :  { %v1048_v8 = vadd.f32 %v1047_v53, %v1046_v46  ;;  %v1078_v59 = vadd.f32 %v1077_v34, %v1076_v37  ;;  %v1112_v23 = vpack.c.bf16 %v1066_v18, %v1066_v18  ;;  %v1097_v10 = vrot.slane %v1006_v61, 4 }
 0x269   :  { %v1053_v2 = vrot.slane %v1052_v43, 1  ;;  %v1093_v9 = vrot.slane %v1092_v6, 2  ;;  %v1086_v12 = vadd.f32 %v1085_v40, %v1004_v41  ;;  %v1084_v15 = vadd.f32 %v1083_v28, %v1082_v49 }
 0x26a   :  { %v1105_v35 = vpack.c.bf16 %v1024_v48, %v1024_v48  ;;  %v1106_v13 = vpack.c.bf16 %v1030_v63, %v1030_v63  ;;  %v1098_v17 = vadd.f32 %v1097_v10, %v1006_v61  ;;  %v1107_v5 = vpack.c.bf16 %v1036_v3, %v1036_v3  ;;  %v2407_v10 = vld [vmem:[#allocation8 + $0xfc] ss:$24 sps:$4 sm:$0xff]  }
 0x26b   :  { %v1094_v55 = vadd.f32 %v1093_v9, %v1092_v6  ;;  %v1108_v7 = vpack.c.bf16 %v1042_v4, %v1042_v4  ;;  %v1087_v16 = vrot.slane %v1086_v12, 2  ;;  %v1109_v20 = vpack.c.bf16 %v1048_v8, %v1048_v8  ;;  %v2399_v9 = vld [vmem:[#allocation8 + $0x128] ss:$24 sps:$4 sm:$0xff]  }
 0x26c   :  { %v1113_v52 = vpack.c.bf16 %v1072_v11, %v1072_v11  ;;  %v1114_v21 = vpack.c.bf16 %v1078_v59, %v1078_v59  ;;  %v1054_v25 = vadd.f32 %v1053_v2, %v1052_v43  ;;  %v1099_v26 = vrot.slane %v1098_v17, 2  ;;  %v2393_v59 = vld [vmem:[#allocation8 + $0x158] ss:$24 sps:$4 sm:$0xff]   ;;  %v2401_v2 = vld [vmem:[#allocation8 + $0x12c] ss:$24 sps:$4 sm:$0xff]  }
 0x26d   :  { %v1095_v27 = vrot.slane %v1094_v55, 1  ;;  %v1152_v14 = vunpack.c.l.b16 %v1104_v51  ;;  %v1088_v32 = vadd.f32 %v1087_v16, %v1086_v12  ;;  %v1115_v22 = vpack.c.bf16 %v1084_v15, %v1084_v15  ;;  %v2405_v12 = vld [vmem:[#allocation8 + $0xf8] ss:$24 sps:$4 sm:$0xff]   ;;  %v2413_v15 = vld [vmem:[#allocation8 + $0xcc] ss:$24 sps:$4 sm:$0xff]  }
 0x26e   :  { %v1151_v36 = vunpack.c.l.b16 %v1103_v45  ;;  %v1153_v31 = vunpack.c.l.b16 %v1105_v35  ;;  %v1100_v39 = vadd.f32 %v1099_v26, %v1098_v17  ;;  %v1154_v44 = vunpack.c.l.b16 %v1106_v13  ;;  %v2411_v35 = vld [vmem:[#allocation8 + $0xc8] ss:$24 sps:$4 sm:$0xff]   ;;  %v2419_v13 = vld [vmem:[#allocation8 + $0x9c] ss:$24 sps:$4 sm:$0xff]   ;;  %v2425_v17 = vld [vmem:[#allocation8 + $0x6c] ss:$24 sps:$4 sm:$0xff]  }
 0x26f   :  { %v1096_v37 = vadd.f32 %v1095_v27, %v1094_v55  ;;  %v1155_v33 = vunpack.c.l.b16 %v1107_v5  ;;  %v1089_v30 = vrot.slane %v1088_v32, 1  ;;  %v1156_v42 = vunpack.c.l.b16 %v1108_v7  ;;  %v2417_v55 = vld [vmem:[#allocation8 + $0x98] ss:$24 sps:$4 sm:$0xff]   ;;  %v2423_v5 = vld [vmem:[#allocation8 + $0x68] ss:$24 sps:$4 sm:$0xff]  }
 0x270   :  { %v1159_v46 = vunpack.c.l.b16 %v1111_v56  ;;  %v1160_v49 = vunpack.c.l.b16 %v1112_v23  ;;  %v1101_v19 = vrot.slane %v1100_v39, 1  ;;  %v1161_v38 = vunpack.c.l.b16 %v1113_v52  ;;  %v2426_v7 = vld [vmem:[#allocation8 + $0x30] ss:$24 sps:$4 sm:$0xff]   ;;  %v2428_v16 = vld [vmem:[#allocation8 + $0x34] ss:$24 sps:$4 sm:$0xff]  }
 0x271   :  { %v1162_v24 = vunpack.c.l.b16 %v1114_v21  ;;  %v1168_v47 = vsel %vm1167_vm1, %v1152_v14, %v1151_v36  ;;  %v1090_v51 = vadd.f32 %v1089_v30, %v1088_v32  ;;  %v1117_v48 = vpack.c.bf16 %v1096_v37, %v1096_v37  ;;  %v2431_v52 = vld [vmem:[#allocation8 + $0x3c] ss:$24 sps:$4 sm:$0xff]   ;;  %1582 = vmatprep.subr.bf16.mxu0 %v2428_v16  ;;  %v2432_v21 = vld [vmem:[#allocation8] ss:$24 sps:$4 sm:$0xff]   ;;  %v2437_v26 = vld [vmem:[#allocation8 + $0xc] ss:$24 sps:$4 sm:$0xff]  }
 0x272   :  { %v1170_v57 = vsel %vm1169_vm2, %v1153_v31, %v1168_v47  ;;  %v1181_v54 = vsel %vm1167_vm1, %v1160_v49, %v1159_v46  ;;  %v1102_v45 = vadd.f32 %v1101_v19, %v1100_v39  ;;  %v1163_v58 = vunpack.c.l.b16 %v1115_v22  ;;  %1583 = vmatpush1.bf16.msra.mxu0 %v2426_v7  ;;  %v2435_v27 = vld [vmem:[#allocation8 + $0x8] ss:$24 sps:$4 sm:$0xff]   ;;  %v2440_v14 = vld [vmem:[#allocation8 + $0x164] ss:$24 sps:$4 sm:$0xff]   ;;  %v2574_v31 = vld [vmem:[#allocation2] sm:$0xff] }
 0x273   :  { %v1172_v50 = vsel %vm1171_vm3, %v1154_v44, %v1170_v57  ;;  %v1182_v60 = vsel %vm1169_vm2, %v1161_v38, %v1181_v54  ;;  %v1110_v53 = vpack.c.bf16 %v1054_v25, %v1054_v25  ;;  %v1116_v34 = vpack.c.bf16 %v1090_v51, %v1090_v51  ;;  %v2434_v25 = vld [vmem:[#allocation8 + $0x4] ss:$24 sps:$4 sm:$0xff]   ;;  %v2438_v30 = vld [vmem:[#allocation8 + $0x160] ss:$24 sps:$4 sm:$0xff]   ;;  %v2443_v46 = vld [vmem:[#allocation8 + $0x134] ss:$24 sps:$4 sm:$0xff]  }
 0x274   :  { %v1174_v62 = vsel %vm1173_vm4, %v1155_v33, %v1172_v50  ;;  %v1183_v18 = vsel %vm1171_vm3, %v1162_v24, %v1182_v60  ;;  %v1118_v63 = vpack.c.bf16 %v1102_v45, %v1102_v45  ;;  %v1157_v1 = vunpack.c.l.b16 %v1109_v20  ;;  %v2429_v20 = vld [vmem:[#allocation8 + $0x38] ss:$24 sps:$4 sm:$0xff]   ;;  %1584 = vmatprep.subr.bf16.mxu0 %v2434_v25  ;;  %v2446_v19 = vld [vmem:[#allocation8 + $0x104] ss:$24 sps:$4 sm:$0xff]   ;;  %v2449_v24 = vld [vmem:[#allocation8 + $0xd4] ss:$24 sps:$4 sm:$0xff]  }
 0x275   :  { %v1176_v41 = vsel %vm1175_vm5, %v1156_v42, %v1174_v62  ;;  %v1164_v3 = vunpack.c.l.b16 %v1116_v34  ;;  %v1165_v4 = vunpack.c.l.b16 %v1117_v48  ;;  %v1184_v61 = vsel %vm1173_vm4, %v1163_v58, %v1183_v18  ;;  %v2575_v39 = vld [vmem:[#allocation2 + $0x8] sm:$0xff]  ;;  %v2441_v49 = vld [vmem:[#allocation8 + $0x130] ss:$24 sps:$4 sm:$0xff]   ;;  %v2455_v57 = vld [vmem:[#allocation8 + $0x74] ss:$24 sps:$4 sm:$0xff]  }
 0x276   :  { %v1178_v28 = vsel %vm1177_vm6, %v1157_v1, %v1176_v41  ;;  %v1158_v43 = vunpack.c.l.b16 %v1110_v53  ;;  %v1166_v11 = vunpack.c.l.b16 %v1118_v63  ;;  %1585 = vmatpush1.bf16.msra.mxu0 %v2432_v21  ;;  %v2444_v38 = vld [vmem:[#allocation8 + $0x100] ss:$24 sps:$4 sm:$0xff]   ;;  %v2447_v47 = vld [vmem:[#allocation8 + $0xd0] ss:$24 sps:$4 sm:$0xff]   ;;  %v2452_v51 = vld [vmem:[#allocation8 + $0xa4] ss:$24 sps:$4 sm:$0xff]  }
 0x277   :  { %v1185_v6 = vsel %vm1175_vm5, %v1164_v3, %v1184_v61  ;;  %1656 = vmatprep.subr.bf16.mxu0 %v2440_v14  ;;  %v2450_v48 = vld [vmem:[#allocation8 + $0xa0] ss:$24 sps:$4 sm:$0xff]   ;;  %v2453_v54 = vld [vmem:[#allocation8 + $0x70] ss:$24 sps:$4 sm:$0xff]   ;;  %v2458_v45 = vld [vmem:[#allocation8 + $0x44] ss:$24 sps:$4 sm:$0xff]  }
 0x278   :  { %v1186_v40 = vsel %vm1177_vm6, %v1165_v4, %v1185_v6  ;;  %v1180_v56 = vsel %vm1179_vm7, %v1158_v43, %v1178_v28  ;;  %v2461_v58 = vld [vmem:[#allocation8 + $0x14] ss:$24 sps:$4 sm:$0xff]   ;;  %v2459_v50 = vld [vmem:[#allocation8 + $0x10] ss:$24 sps:$4 sm:$0xff]   ;;  %v2462_v60 = vld [vmem:[#allocation10 + $0xb8] sm:$0xff]  }
 0x279   :  { %v1187_v8 = vsel %vm1179_vm7, %v1166_v11, %v1186_v40  ;;  %v2463_v53 = vld [vmem:[#allocation10 + $0x78] sm:$0xff]   ;;  %v2465_v62 = vld [vmem:[#allocation10 + $0xb0] sm:$0xff]   ;;  %v2468_v1 = vld [vmem:[#allocation10 + $0xa8] sm:$0xff]  }
 0x27a   :  { %v1188_v23 = vpack.c.b16 %v1187_v8, %v1180_v56  ;;  %v2464_v34 = vld [vmem:[#allocation10 + $0x38] sm:$0xff]   ;;  %v2466_v18 = vld [vmem:[#allocation10 + $0x70] sm:$0xff]   ;;  %v2469_v41 = vld [vmem:[#allocation10 + $0x68] sm:$0xff]  }
 0x27b   :  { %v2467_v63 = vld [vmem:[#allocation10 + $0x30] sm:$0xff]   ;;  %v2470_v3 = vld [vmem:[#allocation10 + $0x28] sm:$0xff]   ;;  %v2471_v4 = vld [vmem:[#allocation10 + $0xa0] sm:$0xff]  }
 0x27c   :  { %2300 = vmatmul.mubr.bf16.vlgmr.msra.gmra.mxu1 %v1188_v23  ;;  %v2472_v28 = vld [vmem:[#allocation10 + $0x60] sm:$0xff]   ;;  %v2474_v43 = vld [vmem:[#allocation10 + $0x98] sm:$0xff]   ;;  %v2477_v40 = vld [vmem:[#allocation10 + $0x90] sm:$0xff]  }
 0x27d   :  { %1614 = vmatpush1.bf16.msra.mxu1 %v2393_v59  ;;  %1645 = vmatprep.mubr.bf16.mxu1 %v2740_v0  ;;  %v2473_v61 = vld [vmem:[#allocation10 + $0x20] sm:$0xff]   ;;  %v2475_v11 = vld [vmem:[#allocation10 + $0x58] sm:$0xff]   ;;  %v2478_v56 = vld [vmem:[#allocation10 + $0x50] sm:$0xff]  }
 0x27e   :  { %1615 = vmatprep.subr.bf16.mxu1 %v2401_v2  ;;  %v2476_v6 = vld [vmem:[#allocation10 + $0x18] sm:$0xff]   ;;  %v2479_v8 = vld [vmem:[#allocation10 + $0x10] sm:$0xff]   ;;  %v2480_v59 = vld [vmem:[#allocation10 + $0x88] sm:$0xff]  }
 0x27f   :  { %v2481_v23 = vld [vmem:[#allocation10 + $0x48] sm:$0xff]  }
 0x280   :  { %v2482_v2 = vld [vmem:[#allocation10 + $0x8] sm:$0xff]  }
 0x281   :  { %1616 = vmatpush1.bf16.msra.mxu1 %v2399_v9  ;;  %v2483_v9 = vld [vmem:[#allocation10 + $0x80] sm:$0xff]  }
 0x282   :  { %1617 = vmatprep.subr.bf16.mxu1 %v2407_v10  ;;  %v2484_v10 = vld [vmem:[#allocation10 + $0x40] sm:$0xff]  }
 0x285   :  { %1618 = vmatpush1.bf16.msra.mxu1 %v2405_v12  ;;  %v2485_v12 = vld [vmem:[#allocation10] sm:$0xff]  }
 0x286   :  { %1619 = vmatprep.subr.bf16.mxu1 %v2413_v15 }
 0x289   :  { %1620 = vmatpush1.bf16.msra.mxu1 %v2411_v35 }
 0x28a   :  { %1621 = vmatprep.subr.bf16.mxu1 %v2419_v13 }
 0x28d   :  { %1622 = vmatpush1.bf16.msra.mxu1 %v2417_v55 }
 0x28e   :  { %1623 = vmatprep.subr.bf16.mxu1 %v2425_v17 }
 0x291   :  { %1624 = vmatpush1.bf16.msra.mxu1 %v2423_v5 }
 0x292   :  { %1625 = vmatprep.subr.bf16.mxu1 %v2431_v52 }
 0x295   :  { %1626 = vmatpush1.bf16.msra.mxu1 %v2429_v20 }
 0x296   :  { %1627 = vmatprep.subr.bf16.mxu1 %v2437_v26 }
 0x299   :  { %1628 = vmatpush1.bf16.msra.mxu1 %v2435_v27 }
 0x29a   :  { %2200 = vmatprep.subr.bf16.mxu1 %v2463_v53 }
 0x33c   :  { %v1272_v32 = vpop.f32.mrf.mxu1 }
 0x33d   :  { %v3042_v37 = vadd.f32 %v2574_v31, %v1272_v32 }
 0x33e   :  { %v2301_v22 = vpop.f32.mrf.mxu1 }
 0x340   :  { %v1275_v36 = vpop.f32.mrf.mxu1 }
 0x341   :  { %v3044_v44 = vadd.f32 %v2575_v39, %v1275_v36 }
 0x342   :  { %v2302_v33 = vpop.f32.mrf.mxu1 }
 0x343   :  { %v1281_v42 = vpack.c.bf16 %v3044_v44, %v3042_v37 }
 0x345   :  { %1603 = vmatmul.mubr.bf16.vlgmr.msra.gmra.mxu0 %v1281_v42  ;;  %1646 = vmatmul.mubr.bf16.vlgmr.msra.gmra.mxu1 %v1281_v42 }
 0x346   :  { %1657 = vmatpush1.bf16.msra.mxu0 %v2438_v30  ;;  %1688 = vmatprep.mubr.bf16.mxu0 %v2740_v0  ;;  %v2456_v0 = vld [vmem:[#allocation8 + $0x40] ss:$24 sps:$4 sm:$0xff]  }
 0x347   :  { %1658 = vmatprep.subr.bf16.mxu0 %v2443_v46  ;;  %2201 = vmatpush3.bf16.msra.mxu1 %v2464_v34 }
 0x348   :  { %2202 = vmatprep.subr.bf16.mxu1 %v2466_v18 }
 0x34a   :  { %1659 = vmatpush1.bf16.msra.mxu0 %v2441_v49 }
 0x34b   :  { %1660 = vmatprep.subr.bf16.mxu0 %v2446_v19  ;;  %2203 = vmatpush3.bf16.msra.mxu1 %v2467_v63 }
 0x34c   :  { %2204 = vmatprep.subr.bf16.mxu1 %v2469_v41 }
 0x34e   :  { %1661 = vmatpush1.bf16.msra.mxu0 %v2444_v38 }
 0x34f   :  { %1662 = vmatprep.subr.bf16.mxu0 %v2449_v24  ;;  %2205 = vmatpush3.bf16.msra.mxu1 %v2470_v3 }
 0x350   :  { %2206 = vmatprep.subr.bf16.mxu1 %v2472_v28 }
 0x352   :  { %1663 = vmatpush1.bf16.msra.mxu0 %v2447_v47 }
 0x353   :  { %1664 = vmatprep.subr.bf16.mxu0 %v2452_v51  ;;  %2207 = vmatpush3.bf16.msra.mxu1 %v2473_v61 }
 0x354   :  { %2208 = vmatprep.subr.bf16.mxu1 %v2475_v11 }
 0x356   :  { %1665 = vmatpush1.bf16.msra.mxu0 %v2450_v48 }
 0x357   :  { %1666 = vmatprep.subr.bf16.mxu0 %v2455_v57  ;;  %2209 = vmatpush3.bf16.msra.mxu1 %v2476_v6 }
 0x358   :  { %2210 = vmatprep.subr.bf16.mxu1 %v2478_v56 }
 0x35a   :  { %1667 = vmatpush1.bf16.msra.mxu0 %v2453_v54 }
 0x35b   :  { %1668 = vmatprep.subr.bf16.mxu0 %v2458_v45  ;;  %2211 = vmatpush3.bf16.msra.mxu1 %v2479_v8 }
 0x35c   :  { %2212 = vmatprep.subr.bf16.mxu1 %v2481_v23 }
 0x35e   :  { %1669 = vmatpush1.bf16.msra.mxu0 %v2456_v0 }
 0x35f   :  { %1670 = vmatprep.subr.bf16.mxu0 %v2461_v58  ;;  %2213 = vmatpush3.bf16.msra.mxu1 %v2482_v2 }
 0x360   :  { %2214 = vmatprep.subr.bf16.mxu1 %v2484_v10 }
 0x362   :  { %1671 = vmatpush1.bf16.msra.mxu0 %v2459_v50 }
 0x363   :  { %2303 = vmatprep.subr.bf16.mxu0 %v2741_v29  ;;  %2215 = vmatpush3.bf16.msra.mxu1 %v2485_v12 }
 0x365   :  { %1689 = vmatmul.mubr.bf16.vlgmr.msra.gmra.mxu0 %v1281_v42 }
 0x366   :  { %2319 = vmatprep.mubr.msk.bf16.mxu0 %vm2742_vm0, %v2741_v29  ;;  %2304 = vmatpush3.bf16.msra.mxu0 %v2462_v60 }
 0x367   :  { %2305 = vmatprep.subr.bf16.mxu0 %v2741_v29 }
 0x36a   :  { %2306 = vmatpush3.bf16.msra.mxu0 %v2465_v62 }
 0x36b   :  { %2307 = vmatprep.subr.bf16.mxu0 %v2741_v29 }
 0x36e   :  { %2308 = vmatpush3.bf16.msra.mxu0 %v2468_v1 }
 0x36f   :  { %2309 = vmatprep.subr.bf16.mxu0 %v2741_v29 }
 0x372   :  { %2310 = vmatpush3.bf16.msra.mxu0 %v2471_v4 }
 0x373   :  { %2311 = vmatprep.subr.bf16.mxu0 %v2741_v29 }
 0x376   :  { %2312 = vmatpush3.bf16.msra.mxu0 %v2474_v43 }
 0x377   :  { %2313 = vmatprep.subr.bf16.mxu0 %v2741_v29 }
 0x37a   :  { %2314 = vmatpush3.bf16.msra.mxu0 %v2477_v40 }
 0x37b   :  { %2315 = vmatprep.subr.bf16.mxu0 %v2741_v29 }
 0x37e   :  { %2316 = vmatpush3.bf16.msra.mxu0 %v2480_v59 }
 0x37f   :  { %2317 = vmatprep.subr.bf16.mxu0 %v2741_v29 }
 0x382   :  { %2318 = vmatpush3.bf16.msra.mxu0 %v2483_v9 }
 0x405   :  { %v1604_v15 = vpop.f32.mrf.mxu0  ;;  %v1647_v35 = vpop.f32.mrf.mxu1 }
 0x406   :  { %v2136_v13 = vmul.f32 -1.442695, %v1604_v15  ;;  %v2138_v55 = vmul.f32 -1.442695, %v1647_v35 }
 0x407   :  { %v1606_v17 = vpop.f32.mrf.mxu0  ;;  %v1649_v5 = vpop.f32.mrf.mxu1 }
 0x408   :  { %2550 = vpow2.f32 %v2136_v13  ;;  %v2137_v7 = vmul.f32 -1.442695, %v1606_v17 }
 0x409   :  { %2552 = vpow2.f32 %v2138_v55  ;;  %v1608_v16 = vpop.f32.mrf.mxu0  ;;  %v1651_v20 = vpop.f32.mrf.mxu1 }
 0x40a   :  { %2554 = vpow2.f32 %v2137_v7  ;;  %v2139_v52 = vmul.f32 -1.442695, %v1608_v16  ;;  %v2141_v21 = vmul.f32 -1.442695, %v1651_v20 }
 0x40b   :  { %v1610_v29 = vpop.f32.mrf.mxu0  ;;  %v1653_v62 = vpop.f32.mrf.mxu1 }
 0x40c   :  { %2556 = vpow2.f32 %v2139_v52  ;;  %v2140_v25 = vmul.f32 -1.442695, %v1610_v29 }
 0x40d   :  { %2558 = vpow2.f32 %v2141_v21 }
 0x40e   :  { %2560 = vpow2.f32 %v2140_v25 }
 0x415   :  { %v2551_v27 = vpop.eup %2550 }
 0x416   :  { %v2553_v26 = vpop.eup %2552  ;;  %v1717_v32 = vadd.f32 1.0, %v2551_v27 }
 0x417   :  { %v2555_v14 = vpop.eup %2554  ;;  %v1719_v22 = vadd.f32 1.0, %v2553_v26 }
 0x418   :  { %v1718_v36 = vadd.f32 1.0, %v2555_v14 }
 0x419   :  { %v2557_v31 = vpop.eup %2556  ;;  %2562 = vrcp.f32 %v1719_v22 }
 0x41a   :  { %v2559_v39 = vpop.eup %2558  ;;  %2564 = vrcp.f32 %v1718_v36  ;;  %v1720_v33 = vadd.f32 1.0, %v2557_v31 }
 0x41b   :  { %v2561_v30 = vpop.eup %2560  ;;  %2566 = vrcp.f32 %v1717_v32  ;;  %v1722_v42 = vadd.f32 1.0, %v2559_v39 }
 0x41c   :  { %2568 = vrcp.f32 %v1720_v33  ;;  %v1721_v46 = vadd.f32 1.0, %v2561_v30 }
 0x41d   :  { %2570 = vrcp.f32 %v1722_v42 }
 0x41e   :  { %2572 = vrcp.f32 %v1721_v46 }
 0x425   :  { %v1690_v49 = vpop.f32.mrf.mxu0 }
 0x426   :  { %v2563_v19 = vpop.eup %2562 }
 0x427   :  { %v2565_v38 = vpop.eup %2564  ;;  %v1692_v24 = vpop.f32.mrf.mxu0  ;;  %v1737_v48 = vmul.f32 %v2563_v19, %v1647_v35 }
 0x428   :  { %v2567_v47 = vpop.eup %2566  ;;  %v1736_v45 = vmul.f32 %v2565_v38, %v1606_v17 }
 0x429   :  { %v2569_v51 = vpop.eup %2568  ;;  %v1694_v57 = vpop.f32.mrf.mxu0  ;;  %v1735_v50 = vmul.f32 %v2567_v47, %v1604_v15  ;;  %v1743_v63 = vmul.f32 %v1737_v48, %v1692_v24 }
 0x42a   :  { %v2571_v54 = vpop.eup %2570  ;;  %v1738_v0 = vmul.f32 %v2569_v51, %v1608_v16  ;;  %v1742_v41 = vmul.f32 %v1736_v45, %v1690_v49 }
 0x42b   :  { %v2573_v58 = vpop.eup %2572  ;;  %v1740_v60 = vmul.f32 %v2571_v54, %v1651_v20  ;;  %v1696_v53 = vpop.f32.mrf.mxu0  ;;  %v1741_v4 = vmul.f32 %v1735_v50, %v1649_v5 }
 0x42c   :  { %v1739_v34 = vmul.f32 %v2573_v58, %v1610_v29  ;;  %v1744_v18 = vmul.f32 %v1738_v0, %v1653_v62 }
 0x42d   :  { %v1746_v1 = vmul.f32 %v1740_v60, %v1696_v53 }
 0x42e   :  { %v1745_v3 = vmul.f32 %v1739_v34, %v1694_v57  ;;  %v1747_v43 = vpack.c.bf16 %v1744_v18, %v1741_v4 }
 0x42f   :  { %v1749_v28 = vpack.c.bf16 %v1746_v1, %v1743_v63 }
 0x430   :  { %v1748_v61 = vpack.c.bf16 %v1745_v3, %v1742_v41 }
 0x431   :  { %2320 = vmatmul.mubr.bf16.vlgmr.msra.gmra.mxu0 %v1749_v28 }
 0x432   :  { %1974 = vmatprep.mubr.bf16.mxu1 %v1748_v61 }
 0x433   :  { %1975 = vmatmul.mubr.bf16.vlgmr.msra.gmra.mxu1 %v1747_v43 }
 0x4f1   :  { %v2017_v11 = vpop.f32.mrf.mxu0 }
 0x4f3   :  { %v2321_v6 = vpop.f32.mrf.mxu0  ;;  %v2216_v40 = vpop.f32.mrf.mxu1 }
 0x4f5   :  { %v2020_v56 = vpop.f32.mrf.mxu0  ;;  %v2217_v8 = vpop.f32.mrf.mxu1 }
 0x4f6   :  { %v2218_v59 = vadd.f32 %v2217_v8, %v2216_v40 }
 0x4f7   :  { %v2322_v23 = vpop.f32.mrf.mxu0  ;;  %v2219_v2 = vpop.f32.mrf.mxu1 }
 0x4f8   :  { %v2018_v9 = vadd.f32 %v2218_v59, %v2017_v11 }
 0x4f9   :  { %v2220_v10 = vpop.f32.mrf.mxu1 }
 0x4fa   :  { %v2024_v12 = vadd.f32 %v2018_v9, %v3042_v37  ;;  %v2221_v15 = vadd.f32 %v2220_v10, %v2219_v2 }
 0x4fc   :  { %2026 = vst [vmem:[#allocation13] sm:$0xff] %v2024_v12  ;;  %v2021_v35 = vadd.f32 %v2221_v15, %v2020_v56 }
 0x4fe   :  { %v2025_v13 = vadd.f32 %v2021_v35, %v3044_v44 }
 0x500   :  { %2027 = vst [vmem:[#allocation13 + $0x8] sm:$0xff] %v2025_v13 }
 0x501   :  { %2707 = shalt.err (!%p2704_p6)
}
 0x502   :  { %2039 = dma.vmem_to_hbm [thread:$0]  %s2034_s5, 256, %s3073_s6, [#allocation4], %s2733_s13, %s2733_s13, %s2734_s14  }
 0x503   :  { %2724 = dma.done.wait [#allocation4], 256  }
 0x504   :  { %2725 = vsyncadd [#allocation4], 4294967040 }
 0x505   :  { %2043 = vsyncpa [#allocation3], 1 }
 0x506   :  { %2044 = vsyncpa [#allocation6], 1 }
 0x507   :  { %2045 = vsyncpa [#allocation9], 1 }
 0x508   :  { %2046 = vsyncpa [#allocation12], 1 }
 0x509   :  { %2047 = vsyncpa [#allocation4], 1 }

</bundles_post_ra>
